<compile_context>
chip_gen: v7x
topology: tpu7x:2x2x1
jax: 0.10.0
libtpu: 0.0.40
codegen_flags: <defaults>
</compile_context>

<pallas_src>
import jax
import jax.numpy as jnp
from jax import lax
from jax.experimental import pallas as pl
from jax.experimental.pallas import tpu as pltpu

LEAKY_SLOPE = 0.01     # nn.LeakyReLU default
BN_EPS = 1e-5          # nn.BatchNorm2d default
LANE_TILE = 2048       # target lane chunk; multiple of 256 (v6e/v7x MXU width)


def _round_up(x, m):
    return (x + m - 1) // m * m


def _conv_stats_kernel(w_ref, p_ref, y_ref, sum_ref, sumsq_ref, acc_sum, acc_sq):
    """Conv GEMM over one lane chunk + per-channel BatchNorm statistics.

    w_ref:     (OC, K)        bf16 conv weight matrix (resident across grid)
    p_ref:     (K, LANE)      bf16 im2col patches, lane chunk
    y_ref:     (OC, LANE)     bf16 pre-BN conv output (staged for phase 2)
    sum_ref:   (1, OC, 1)     f32 per-core per-channel sum
    sumsq_ref: (1, OC, 1)     f32 per-core per-channel sum of squares
    acc_sum:   (OC, LANE)     f32 VMEM lane-wise accumulator
    acc_sq:    (OC, LANE)     f32 VMEM lane-wise accumulator
    """
    j = pl.program_id(1)

    @pl.when(j == 0)
    def _init():
        acc_sum[...] = jnp.zeros_like(acc_sum)
        acc_sq[...] = jnp.zeros_like(acc_sq)

    # MXU: bf16 operands, f32 accumulation.
    y = jnp.dot(w_ref[...], p_ref[...], preferred_element_type=jnp.float32)
    y_ref[...] = y.astype(y_ref.dtype)
    acc_sum[...] += y
    acc_sq[...] += y * y

    # Cross-lane (XLU) reduction only once, at the last step of this core.
    @pl.when(j == pl.num_programs(1) - 1)
    def _flush():
        sum_ref[0] = jnp.sum(acc_sum[...], axis=1, keepdims=True)
        sumsq_ref[0] = jnp.sum(acc_sq[...], axis=1, keepdims=True)


def _bn_lrelu_kernel(y_ref, scale_ref, shift_ref, o_ref):
    """Folded BatchNorm affine + LeakyReLU over one lane chunk (f32 math).

    y_ref:     (OC, LANE) bf16 pre-BN conv output
    scale_ref: (OC, 1)    f32 gamma * rsqrt(var + eps)
    shift_ref: (OC, 1)    f32 beta - mean * scale
    o_ref:     (OC, LANE) bf16 between layers, f32 for the final layer
    """
    z = y_ref[...].astype(jnp.float32) * scale_ref[...] + shift_ref[...]
    o_ref[...] = jnp.where(z > 0, z, LEAKY_SLOPE * z).astype(o_ref.dtype)


def block_forward(x_cnhw, w, gamma, beta, stride, padding, out_dtype):
    """One Block = Conv2d (bias dropped, see note) + BatchNorm2d(train) + LeakyReLU.

    x_cnhw: (C, N, H, W) bf16 ("CNHW" lane-dense layout).
    Returns (OC, N, OH, OW) in `out_dtype`.

    The conv bias is omitted on purpose: a per-channel constant is exactly
    removed by training-mode BatchNorm's mean subtraction (dead work forward).
    """
    _c, n, _h, _w = x_cnhw.shape
    oc, _, kh, kw = w.shape

    # One fused XLA gather: (K, N, OH, OW); feature ordering (C, KH, KW), the
    # same ordering as w.reshape(OC, -1) from PyTorch OIHW weights.
    patches = lax.conv_general_dilated_patches(
        x_cnhw,
        filter_shape=(kh, kw),
        window_strides=(stride, stride),
        padding=((padding, padding), (padding, padding)),
        dimension_numbers=("CNHW", "OIHW", "CNHW"),
    )
    k, _, oh, ow = patches.shape
    m = n * oh * ow
    patches = patches.reshape(k, m)                       # contiguous reshape

    # Lane chunking: multiple of 256, as large as a few MiB of VMEM allows.
    lane = min(LANE_TILE, _round_up(m, 256))
    mp = _round_up(m, 2 * lane)     # even chunk count -> 2-way core split
    if mp != m:
        # zero lanes: neutral for the GEMM and for sum / sum-of-squares
        patches = jnp.pad(patches, ((0, 0), (0, mp - m)))
    half = mp // (2 * lane)

    wmat = w.reshape(oc, k).astype(jnp.bfloat16)          # no K padding

    # ---- phase 1: conv GEMM + BN statistics (dual-core capable) -------------
    vmem1 = (2 * oc * k * 2 + 2 * k * lane * 2 + 2 * oc * lane * 2
             + 2 * oc * lane * 4 + 8 * oc * 4 + (4 << 20))
    vmem1 = int(min(max(vmem1, 16 << 20), 40 << 20))      # fits v7x 64 MiB VMEM
    cost1 = pl.CostEstimate(
        flops=2 * oc * k * mp + 3 * oc * mp,
        transcendentals=0,
        bytes_accessed=k * mp * 2 + oc * k * 2 + oc * mp * 2 + 8 * oc * 4,
    )
    y, psum, psq = pl.pallas_call(
        _conv_stats_kernel,
        grid=(2, half),
        in_specs=[
            pl.BlockSpec((oc, k), lambda c_, j: (0, 0)),
            pl.BlockSpec((k, lane), lambda c_, j: (0, c_ * half + j)),
        ],
        out_specs=(
            pl.BlockSpec((oc, lane), lambda c_, j: (0, c_ * half + j)),
            pl.BlockSpec((1, oc, 1), lambda c_, j: (c_, 0, 0)),
            pl.BlockSpec((1, oc, 1), lambda c_, j: (c_, 0, 0)),
        ),
        out_shape=(
            jax.ShapeDtypeStruct((oc, mp), jnp.bfloat16),
            jax.ShapeDtypeStruct((2, oc, 1), jnp.float32),
            jax.ShapeDtypeStruct((2, oc, 1), jnp.float32),
        ),
        scratch_shapes=[
            pltpu.VMEM((oc, lane), jnp.float32),
            pltpu.VMEM((oc, lane), jnp.float32),
        ],
        compiler_params=pltpu.CompilerParams(
            dimension_semantics=("parallel", "arbitrary"),
            vmem_limit_bytes=vmem1,
        ),
        cost_estimate=cost1,
    )(wmat, patches)

    # ---- fold BN(train) statistics into one scale/shift per channel (tiny) --
    count = float(m)                                       # true element count
    ssum = jnp.sum(psum, axis=0)                           # reduce core partials
    ssq = jnp.sum(psq, axis=0)
    mean = ssum / count
    var = ssq / count - mean * mean                        # biased var (training)
    scale = gamma.reshape(oc, 1) * lax.rsqrt(var + BN_EPS)
    shift = beta.reshape(oc, 1) - mean * scale

    # ---- phase 2: normalize + LeakyReLU (fully parallel over lane chunks) ---
    out_isz = jnp.dtype(out_dtype).itemsize
    vmem2 = int(min(max(2 * oc * lane * (2 + out_isz) + 4 * oc * 4 + (4 << 20),
                        16 << 20), 40 << 20))
    cost2 = pl.CostEstimate(
        flops=4 * oc * mp,
        transcendentals=0,
        bytes_accessed=oc * mp * (2 + out_isz) + 2 * oc * 4,
    )
    out = pl.pallas_call(
        _bn_lrelu_kernel,
        grid=(mp // lane,),
        in_specs=[
            pl.BlockSpec((oc, lane), lambda i: (0, i)),
            pl.BlockSpec((oc, 1), lambda i: (0, 0)),
            pl.BlockSpec((oc, 1), lambda i: (0, 0)),
        ],
        out_specs=pl.BlockSpec((oc, lane), lambda i: (0, i)),
        out_shape=jax.ShapeDtypeStruct((oc, mp), out_dtype),
        compiler_params=pltpu.CompilerParams(
            dimension_semantics=("parallel",),
            vmem_limit_bytes=vmem2,
        ),
        cost_estimate=cost2,
    )(y, scale.astype(jnp.float32), shift.astype(jnp.float32))

    # strip lane padding; stay in CNHW for the next layer's patch extraction.
    return out[:, :m].reshape(oc, n, oh, ow)


# (in_f, out_f, kernel, stride, padding) for conv1/conv2/conv3
def _layer_cfg(frames):
    return [
        (frames, 16, 8, 4, 0),
        (16, 32, 4, 2, 0),
        (32, 32, 3, 1, 1),
    ]


def init_params(key, frames):
    params = []
    for (in_f, out_f, ksz, _, _) in _layer_cfg(frames):
        key, kw_, kb_ = jax.random.split(key, 3)
        w = 0.05 * jax.random.normal(kw_, (out_f, in_f, ksz, ksz), jnp.float32)
        # Conv bias kept only for parameter parity with the PyTorch module; it
        # is exactly cancelled by BatchNorm's mean subtraction, so unused.
        b = 0.01 * jax.random.normal(kb_, (out_f,), jnp.float32)
        gamma = jnp.ones((out_f,), jnp.float32)
        beta = jnp.zeros((out_f,), jnp.float32)
        params.append((w, b, gamma, beta))
    return params


def conv_frames_forward(x, params, frames):
    cfg = _layer_cfg(frames)
    last = len(cfg) - 1
    # Single up-front layout change: NCHW -> CNHW (lane-dense), bf16.
    h = jnp.transpose(x, (1, 0, 2, 3)).astype(jnp.bfloat16)
    for li, ((w, _b, gamma, beta), (_, _, _, stride, padding)) in enumerate(
            zip(params, cfg)):
        out_dtype = jnp.float32 if li == last else jnp.bfloat16
        h = block_forward(h, w, gamma, beta, stride, padding, out_dtype)
    # Tiny final tensor: CNHW -> NCHW, then x.flatten(1) as in PyTorch.
    h = jnp.transpose(h, (1, 0, 2, 3))
    return h.reshape(h.shape[0], -1)


def _reference_forward(x, params, frames):
    """Pure-JAX f32 reference replicating the PyTorch module (training-mode BN)."""
    cfg = _layer_cfg(frames)
    h = x.astype(jnp.float32)
    for (w, b, gamma, beta), (_, _, _, stride, padding) in zip(params, cfg):
        y = lax.conv_general_dilated(
            h, w, window_strides=(stride, stride),
            padding=((padding, padding), (padding, padding)),
            dimension_numbers=("NCHW", "OIHW", "NCHW"))
        y = y + b.reshape(1, -1, 1, 1)
        mean = jnp.mean(y, axis=(0, 2, 3), keepdims=True)
        var = jnp.mean((y - mean) ** 2, axis=(0, 2, 3), keepdims=True)
        y = (y - mean) * lax.rsqrt(var + BN_EPS)
        y = y * gamma.reshape(1, -1, 1, 1) + beta.reshape(1, -1, 1, 1)
        h = jnp.where(y > 0, y, LEAKY_SLOPE * y)
    return h.reshape(h.shape[0], -1)


if __name__ == "__main__":
    frames = 4
    batch, spatial = 2, 32  # 32 -> conv1 -> 7 -> conv2 -> 2 -> conv3 -> 2

    key = jax.random.PRNGKey(0)
    kx, kparam = jax.random.split(key)
    x = jax.random.normal(kx, (batch, frames, spatial, spatial), jnp.float32)
    params = init_params(kparam, frames)

    fwd = jax.jit(lambda xx, pp: conv_frames_forward(xx, pp, frames))
    out = jax.block_until_ready(fwd(x, params))

    assert out.shape == (batch, 32 * 2 * 2), out.shape
    assert out.dtype == jnp.float32
    assert bool(jnp.all(jnp.isfinite(out)))

    # Loose tolerance: kernel uses bf16 patches/weights/staging (f32 accumulate),
    # reference is full f32. Catches any feature-ordering / layout permutation bug.
    ref = jax.block_until_ready(
        jax.jit(lambda xx, pp: _reference_forward(xx, pp, frames))(x, params))
    max_err = float(jnp.max(jnp.abs(out - ref)))
    assert max_err < 0.2, f"max abs error vs f32 reference: {max_err}"

    print("KERNEL_OK")
</pallas_src>

<mosaic_0001>
module attributes {stable_mosaic.version = 11 : i64} {
  func.func @_conv_stats_kernel(%arg0: i32, %arg1: i32, %arg2: memref<16x256xbf16, #tpu.memory_space<vmem>>, %arg3: memref<256x256xbf16, #tpu.memory_space<vmem>>, %arg4: memref<16x256xbf16, #tpu.memory_space<vmem>>, %arg5: memref<1x16x1xf32, #tpu.memory_space<vmem>>, %arg6: memref<1x16x1xf32, #tpu.memory_space<vmem>>, %arg7: memref<16x256xf32, #tpu.memory_space<vmem>>, %arg8: memref<16x256xf32, #tpu.memory_space<vmem>>) attributes {dimension_semantics = [#tpu.dimension_semantics<parallel>, #tpu.dimension_semantics<arbitrary>], iteration_bounds = array<i64: 2, 1>, scalar_prefetch = 0 : i64, scratch_operands = 2 : i64, tpu.core_type = #tpu.core_type<tc>, window_params = [{pipeline_mode = #tpu.pipeline_mode<synchronous>, transform_indices = @transform_0, window_bounds = array<i64: 16, 256>}, {transform_indices = @transform_1, window_bounds = array<i64: 256, 256>}, {transform_indices = @transform_2, window_bounds = array<i64: 16, 256>}, {transform_indices = @transform_3, window_bounds = array<i64: 1, 16, 1>}, {transform_indices = @transform_4, window_bounds = array<i64: 1, 16, 1>}]} {
    %c0_i32 = arith.constant 0 : i32
    %0 = arith.cmpi eq, %arg1, %c0_i32 : i32
    %1 = arith.extui %0 : i1 to i32
    %c0_i32_0 = arith.constant 0 : i32
    %2 = arith.cmpi ne, %1, %c0_i32_0 : i32
    scf.if %2 {
      %cst_16 = arith.constant 0.000000e+00 : f32
      %18 = vector.broadcast %cst_16 : f32 to vector<16x256xf32>
      %c0_17 = arith.constant 0 : index
      %c0_18 = arith.constant 0 : index
      %19 = vector.load %arg7[%c0_17, %c0_18] : memref<16x256xf32, #tpu.memory_space<vmem>>, vector<16x256xf32>
      tpu.vector_store %arg7[%c0_17, %c0_18], %18 {strides = array<i32>} : memref<16x256xf32, #tpu.memory_space<vmem>>, vector<16x256xf32>,
      %cst_19 = arith.constant 0.000000e+00 : f32
      %20 = vector.broadcast %cst_19 : f32 to vector<16x256xf32>
      %c0_20 = arith.constant 0 : index
      %c0_21 = arith.constant 0 : index
      %21 = vector.load %arg8[%c0_20, %c0_21] : memref<16x256xf32, #tpu.memory_space<vmem>>, vector<16x256xf32>
      tpu.vector_store %arg8[%c0_20, %c0_21], %20 {strides = array<i32>} : memref<16x256xf32, #tpu.memory_space<vmem>>, vector<16x256xf32>,
    } else {
    }
    %c0 = arith.constant 0 : index
    %c0_1 = arith.constant 0 : index
    %3 = vector.load %arg2[%c0, %c0_1] : memref<16x256xbf16, #tpu.memory_space<vmem>>, vector<16x256xbf16>
    %c0_2 = arith.constant 0 : index
    %c0_3 = arith.constant 0 : index
    %4 = vector.load %arg3[%c0_2, %c0_3] : memref<256x256xbf16, #tpu.memory_space<vmem>>, vector<256x256xbf16>
    %cst = arith.constant dense<0.000000e+00> : vector<16x256xf32>
    %5 = tpu.matmul %3, %4, %cst {dimension_numbers = #tpu.dot_dimension_numbers<[1], [0], [0], [1], [0, 0, 1, 1], [], []>} : vector<16x256xbf16>, vector<256x256xbf16>, vector<16x256xf32> -> vector<16x256xf32>
    %6 = arith.truncf %5 : vector<16x256xf32> to vector<16x256xbf16>
    %c0_4 = arith.constant 0 : index
    %c0_5 = arith.constant 0 : index
    %7 = vector.load %arg4[%c0_4, %c0_5] : memref<16x256xbf16, #tpu.memory_space<vmem>>, vector<16x256xbf16>
    tpu.vector_store %arg4[%c0_4, %c0_5], %6 {strides = array<i32>} : memref<16x256xbf16, #tpu.memory_space<vmem>>, vector<16x256xbf16>,
    %c0_6 = arith.constant 0 : index
    %c0_7 = arith.constant 0 : index
    %8 = vector.load %arg7[%c0_6, %c0_7] : memref<16x256xf32, #tpu.memory_space<vmem>>, vector<16x256xf32>
    %9 = arith.addf %8, %5 : vector<16x256xf32>
    %c0_8 = arith.constant 0 : index
    %c0_9 = arith.constant 0 : index
    %10 = vector.load %arg7[%c0_8, %c0_9] : memref<16x256xf32, #tpu.memory_space<vmem>>, vector<16x256xf32>
    tpu.vector_store %arg7[%c0_8, %c0_9], %9 {strides = array<i32>} : memref<16x256xf32, #tpu.memory_space<vmem>>, vector<16x256xf32>,
    %c0_10 = arith.constant 0 : index
    %c0_11 = arith.constant 0 : index
    %11 = vector.load %arg8[%c0_10, %c0_11] : memref<16x256xf32, #tpu.memory_space<vmem>>, vector<16x256xf32>
    %12 = arith.mulf %5, %5 : vector<16x256xf32>
    %13 = arith.addf %11, %12 : vector<16x256xf32>
    %c0_12 = arith.constant 0 : index
    %c0_13 = arith.constant 0 : index
    %14 = vector.load %arg8[%c0_12, %c0_13] : memref<16x256xf32, #tpu.memory_space<vmem>>, vector<16x256xf32>
    tpu.vector_store %arg8[%c0_12, %c0_13], %13 {strides = array<i32>} : memref<16x256xf32, #tpu.memory_space<vmem>>, vector<16x256xf32>,
    %c0_i32_14 = arith.constant 0 : i32
    %15 = arith.cmpi eq, %arg1, %c0_i32_14 : i32
    %16 = arith.extui %15 : i1 to i32
    %c0_i32_15 = arith.constant 0 : i32
    %17 = arith.cmpi ne, %16, %c0_i32_15 : i32
    scf.if %17 {
      %c0_16 = arith.constant 0 : index
      %c0_17 = arith.constant 0 : index
      %18 = vector.load %arg7[%c0_16, %c0_17] : memref<16x256xf32, #tpu.memory_space<vmem>>, vector<16x256xf32>
      %cst_18 = arith.constant dense<0.000000e+00> : vector<16xf32>
      %19 = vector.multi_reduction <add>, %18, %cst_18 [1] : vector<16x256xf32> to vector<16xf32>
      %20 = vector.shape_cast %19 : vector<16xf32> to vector<16x1xf32>
      %c0_19 = arith.constant 0 : index
      %c0_20 = arith.constant 0 : index
      %c0_21 = arith.constant 0 : index
      %21 = vector.load %arg5[%c0_19, %c0_20, %c0_21] : memref<1x16x1xf32, #tpu.memory_space<vmem>>, vector<1x16x1xf32>
      %22 = vector.shape_cast %21 : vector<1x16x1xf32> to vector<16x1xf32>
      %23 = vector.shape_cast %20 : vector<16x1xf32> to vector<1x16x1xf32>
      tpu.vector_store %arg5[%c0_19, %c0_20, %c0_21], %23 {strides = array<i32>} : memref<1x16x1xf32, #tpu.memory_space<vmem>>, vector<1x16x1xf32>,
      %c0_22 = arith.constant 0 : index
      %c0_23 = arith.constant 0 : index
      %24 = vector.load %arg8[%c0_22, %c0_23] : memref<16x256xf32, #tpu.memory_space<vmem>>, vector<16x256xf32>
      %cst_24 = arith.constant dense<0.000000e+00> : vector<16xf32>
      %25 = vector.multi_reduction <add>, %24, %cst_24 [1] : vector<16x256xf32> to vector<16xf32>
      %26 = vector.shape_cast %25 : vector<16xf32> to vector<16x1xf32>
      %c0_25 = arith.constant 0 : index
      %c0_26 = arith.constant 0 : index
      %c0_27 = arith.constant 0 : index
      %27 = vector.load %arg6[%c0_25, %c0_26, %c0_27] : memref<1x16x1xf32, #tpu.memory_space<vmem>>, vector<1x16x1xf32>
      %28 = vector.shape_cast %27 : vector<1x16x1xf32> to vector<16x1xf32>
      %29 = vector.shape_cast %26 : vector<16x1xf32> to vector<1x16x1xf32>
      tpu.vector_store %arg6[%c0_25, %c0_26, %c0_27], %29 {strides = array<i32>} : memref<1x16x1xf32, #tpu.memory_space<vmem>>, vector<1x16x1xf32>,
    } else {
    }
    return
  }
  func.func @transform_0(%arg0: i32, %arg1: i32) -> (i32, i32) {
    %c0_i32 = arith.constant 0 : i32
    %c0_i32_0 = arith.constant 0 : i32
    %c0_i32_1 = arith.constant 0 : i32
    return %c0_i32, %c0_i32_0 : i32, i32
  }
  func.func @transform_1(%arg0: i32, %arg1: i32) -> (i32, i32) {
    %c1_i32 = arith.constant 1 : i32
    %0 = arith.muli %arg0, %c1_i32 : i32
    %1 = arith.addi %0, %arg1 : i32
    %c0_i32 = arith.constant 0 : i32
    %c0_i32_0 = arith.constant 0 : i32
    return %c0_i32, %1 : i32, i32
  }
  func.func @transform_2(%arg0: i32, %arg1: i32) -> (i32, i32) {
    %c1_i32 = arith.constant 1 : i32
    %0 = arith.muli %arg0, %c1_i32 : i32
    %1 = arith.addi %0, %arg1 : i32
    %c0_i32 = arith.constant 0 : i32
    %c0_i32_0 = arith.constant 0 : i32
    return %c0_i32, %1 : i32, i32
  }
  func.func @transform_3(%arg0: i32, %arg1: i32) -> (i32, i32, i32) {
    %c0_i32 = arith.constant 0 : i32
    %c0_i32_0 = arith.constant 0 : i32
    %c0_i32_1 = arith.constant 0 : i32
    return %arg0, %c0_i32, %c0_i32_0 : i32, i32, i32
  }
  func.func @transform_4(%arg0: i32, %arg1: i32) -> (i32, i32, i32) {
    %c0_i32 = arith.constant 0 : i32
    %c0_i32_0 = arith.constant 0 : i32
    %c0_i32_1 = arith.constant 0 : i32
    return %arg0, %c0_i32, %c0_i32_0 : i32, i32, i32
  }
}

module attributes {stable_mosaic.version = 11 : i64} {
  func.func @_bn_lrelu_kernel(%arg0: i32, %arg1: memref<16x256xbf16, #tpu.memory_space<vmem>>, %arg2: memref<16x1xf32, #tpu.memory_space<vmem>>, %arg3: memref<16x1xf32, #tpu.memory_space<vmem>>, %arg4: memref<16x256xbf16, #tpu.memory_space<vmem>>) attributes {dimension_semantics = [#tpu.dimension_semantics<parallel>], iteration_bounds = array<i64: 2>, scalar_prefetch = 0 : i64, scratch_operands = 0 : i64, tpu.core_type = #tpu.core_type<tc>, window_params = [{transform_indices = @transform_0, window_bounds = array<i64: 16, 256>}, {pipeline_mode = #tpu.pipeline_mode<synchronous>, transform_indices = @transform_1, window_bounds = array<i64: 16, 1>}, {pipeline_mode = #tpu.pipeline_mode<synchronous>, transform_indices = @transform_2, window_bounds = array<i64: 16, 1>}, {transform_indices = @transform_3, window_bounds = array<i64: 16, 256>}]} {
    %c0 = arith.constant 0 : index
    %c0_0 = arith.constant 0 : index
    %0 = vector.load %arg1[%c0, %c0_0] : memref<16x256xbf16, #tpu.memory_space<vmem>>, vector<16x256xbf16>
    %1 = arith.extf %0 : vector<16x256xbf16> to vector<16x256xf32>
    %c0_1 = arith.constant 0 : index
    %c0_2 = arith.constant 0 : index
    %2 = vector.load %arg2[%c0_1, %c0_2] : memref<16x1xf32, #tpu.memory_space<vmem>>, vector<16x1xf32>
    %3 = vector.broadcast %2 : vector<16x1xf32> to vector<16x256xf32>
    %4 = arith.mulf %1, %3 : vector<16x256xf32>
    %c0_3 = arith.constant 0 : index
    %c0_4 = arith.constant 0 : index
    %5 = vector.load %arg3[%c0_3, %c0_4] : memref<16x1xf32, #tpu.memory_space<vmem>>, vector<16x1xf32>
    %6 = vector.broadcast %5 : vector<16x1xf32> to vector<16x256xf32>
    %7 = arith.addf %4, %6 : vector<16x256xf32>
    %cst = arith.constant 0.000000e+00 : f32
    %8 = vector.broadcast %cst : f32 to vector<16x256xf32>
    %9 = arith.cmpf ogt, %7, %8 : vector<16x256xf32>
    %cst_5 = arith.constant 0.00999999977 : f32
    %10 = vector.broadcast %cst_5 : f32 to vector<16x256xf32>
    %11 = arith.mulf %10, %7 : vector<16x256xf32>
    %12 = arith.select %9, %7, %11 : vector<16x256xi1>, vector<16x256xf32>
    %13 = arith.truncf %12 : vector<16x256xf32> to vector<16x256xbf16>
    %c0_6 = arith.constant 0 : index
    %c0_7 = arith.constant 0 : index
    %14 = vector.load %arg4[%c0_6, %c0_7] : memref<16x256xbf16, #tpu.memory_space<vmem>>, vector<16x256xbf16>
    tpu.vector_store %arg4[%c0_6, %c0_7], %13 {strides = array<i32>} : memref<16x256xbf16, #tpu.memory_space<vmem>>, vector<16x256xbf16>,
    return
  }
  func.func @transform_0(%arg0: i32) -> (i32, i32) {
    %c0_i32 = arith.constant 0 : i32
    %c0_i32_0 = arith.constant 0 : i32
    return %c0_i32, %arg0 : i32, i32
  }
  func.func @transform_1(%arg0: i32) -> (i32, i32) {
    %c0_i32 = arith.constant 0 : i32
    %c0_i32_0 = arith.constant 0 : i32
    %c0_i32_1 = arith.constant 0 : i32
    return %c0_i32, %c0_i32_0 : i32, i32
  }
  func.func @transform_2(%arg0: i32) -> (i32, i32) {
    %c0_i32 = arith.constant 0 : i32
    %c0_i32_0 = arith.constant 0 : i32
    %c0_i32_1 = arith.constant 0 : i32
    return %c0_i32, %c0_i32_0 : i32, i32
  }
  func.func @transform_3(%arg0: i32) -> (i32, i32) {
    %c0_i32 = arith.constant 0 : i32
    %c0_i32_0 = arith.constant 0 : i32
    return %c0_i32, %arg0 : i32, i32
  }
}

module attributes {stable_mosaic.version = 11 : i64} {
  func.func @_conv_stats_kernel(%arg0: i32, %arg1: i32, %arg2: memref<32x256xbf16, #tpu.memory_space<vmem>>, %arg3: memref<256x256xbf16, #tpu.memory_space<vmem>>, %arg4: memref<32x256xbf16, #tpu.memory_space<vmem>>, %arg5: memref<1x32x1xf32, #tpu.memory_space<vmem>>, %arg6: memref<1x32x1xf32, #tpu.memory_space<vmem>>, %arg7: memref<32x256xf32, #tpu.memory_space<vmem>>, %arg8: memref<32x256xf32, #tpu.memory_space<vmem>>) attributes {dimension_semantics = [#tpu.dimension_semantics<parallel>, #tpu.dimension_semantics<arbitrary>], iteration_bounds = array<i64: 2, 1>, scalar_prefetch = 0 : i64, scratch_operands = 2 : i64, tpu.core_type = #tpu.core_type<tc>, window_params = [{pipeline_mode = #tpu.pipeline_mode<synchronous>, transform_indices = @transform_0, window_bounds = array<i64: 32, 256>}, {transform_indices = @transform_1, window_bounds = array<i64: 256, 256>}, {transform_indices = @transform_2, window_bounds = array<i64: 32, 256>}, {transform_indices = @transform_3, window_bounds = array<i64: 1, 32, 1>}, {transform_indices = @transform_4, window_bounds = array<i64: 1, 32, 1>}]} {
    %c0_i32 = arith.constant 0 : i32
    %0 = arith.cmpi eq, %arg1, %c0_i32 : i32
    %1 = arith.extui %0 : i1 to i32
    %c0_i32_0 = arith.constant 0 : i32
    %2 = arith.cmpi ne, %1, %c0_i32_0 : i32
    scf.if %2 {
      %cst_16 = arith.constant 0.000000e+00 : f32
      %18 = vector.broadcast %cst_16 : f32 to vector<32x256xf32>
      %c0_17 = arith.constant 0 : index
      %c0_18 = arith.constant 0 : index
      %19 = vector.load %arg7[%c0_17, %c0_18] : memref<32x256xf32, #tpu.memory_space<vmem>>, vector<32x256xf32>
      tpu.vector_store %arg7[%c0_17, %c0_18], %18 {strides = array<i32>} : memref<32x256xf32, #tpu.memory_space<vmem>>, vector<32x256xf32>,
      %cst_19 = arith.constant 0.000000e+00 : f32
      %20 = vector.broadcast %cst_19 : f32 to vector<32x256xf32>
      %c0_20 = arith.constant 0 : index
      %c0_21 = arith.constant 0 : index
      %21 = vector.load %arg8[%c0_20, %c0_21] : memref<32x256xf32, #tpu.memory_space<vmem>>, vector<32x256xf32>
      tpu.vector_store %arg8[%c0_20, %c0_21], %20 {strides = array<i32>} : memref<32x256xf32, #tpu.memory_space<vmem>>, vector<32x256xf32>,
    } else {
    }
    %c0 = arith.constant 0 : index
    %c0_1 = arith.constant 0 : index
    %3 = vector.load %arg2[%c0, %c0_1] : memref<32x256xbf16, #tpu.memory_space<vmem>>, vector<32x256xbf16>
    %c0_2 = arith.constant 0 : index
    %c0_3 = arith.constant 0 : index
    %4 = vector.load %arg3[%c0_2, %c0_3] : memref<256x256xbf16, #tpu.memory_space<vmem>>, vector<256x256xbf16>
    %cst = arith.constant dense<0.000000e+00> : vector<32x256xf32>
    %5 = tpu.matmul %3, %4, %cst {dimension_numbers = #tpu.dot_dimension_numbers<[1], [0], [0], [1], [0, 0, 1, 1], [], []>} : vector<32x256xbf16>, vector<256x256xbf16>, vector<32x256xf32> -> vector<32x256xf32>
    %6 = arith.truncf %5 : vector<32x256xf32> to vector<32x256xbf16>
    %c0_4 = arith.constant 0 : index
    %c0_5 = arith.constant 0 : index
    %7 = vector.load %arg4[%c0_4, %c0_5] : memref<32x256xbf16, #tpu.memory_space<vmem>>, vector<32x256xbf16>
    tpu.vector_store %arg4[%c0_4, %c0_5], %6 {strides = array<i32>} : memref<32x256xbf16, #tpu.memory_space<vmem>>, vector<32x256xbf16>,
    %c0_6 = arith.constant 0 : index
    %c0_7 = arith.constant 0 : index
    %8 = vector.load %arg7[%c0_6, %c0_7] : memref<32x256xf32, #tpu.memory_space<vmem>>, vector<32x256xf32>
    %9 = arith.addf %8, %5 : vector<32x256xf32>
    %c0_8 = arith.constant 0 : index
    %c0_9 = arith.constant 0 : index
    %10 = vector.load %arg7[%c0_8, %c0_9] : memref<32x256xf32, #tpu.memory_space<vmem>>, vector<32x256xf32>
    tpu.vector_store %arg7[%c0_8, %c0_9], %9 {strides = array<i32>} : memref<32x256xf32, #tpu.memory_space<vmem>>, vector<32x256xf32>,
    %c0_10 = arith.constant 0 : index
    %c0_11 = arith.constant 0 : index
    %11 = vector.load %arg8[%c0_10, %c0_11] : memref<32x256xf32, #tpu.memory_space<vmem>>, vector<32x256xf32>
    %12 = arith.mulf %5, %5 : vector<32x256xf32>
    %13 = arith.addf %11, %12 : vector<32x256xf32>
    %c0_12 = arith.constant 0 : index
    %c0_13 = arith.constant 0 : index
    %14 = vector.load %arg8[%c0_12, %c0_13] : memref<32x256xf32, #tpu.memory_space<vmem>>, vector<32x256xf32>
    tpu.vector_store %arg8[%c0_12, %c0_13], %13 {strides = array<i32>} : memref<32x256xf32, #tpu.memory_space<vmem>>, vector<32x256xf32>,
    %c0_i32_14 = arith.constant 0 : i32
    %15 = arith.cmpi eq, %arg1, %c0_i32_14 : i32
    %16 = arith.extui %15 : i1 to i32
    %c0_i32_15 = arith.constant 0 : i32
    %17 = arith.cmpi ne, %16, %c0_i32_15 : i32
    scf.if %17 {
      %c0_16 = arith.constant 0 : index
      %c0_17 = arith.constant 0 : index
      %18 = vector.load %arg7[%c0_16, %c0_17] : memref<32x256xf32, #tpu.memory_space<vmem>>, vector<32x256xf32>
      %cst_18 = arith.constant dense<0.000000e+00> : vector<32xf32>
      %19 = vector.multi_reduction <add>, %18, %cst_18 [1] : vector<32x256xf32> to vector<32xf32>
      %20 = vector.shape_cast %19 : vector<32xf32> to vector<32x1xf32>
      %c0_19 = arith.constant 0 : index
      %c0_20 = arith.constant 0 : index
      %c0_21 = arith.constant 0 : index
      %21 = vector.load %arg5[%c0_19, %c0_20, %c0_21] : memref<1x32x1xf32, #tpu.memory_space<vmem>>, vector<1x32x1xf32>
      %22 = vector.shape_cast %21 : vector<1x32x1xf32> to vector<32x1xf32>
      %23 = vector.shape_cast %20 : vector<32x1xf32> to vector<1x32x1xf32>
      tpu.vector_store %arg5[%c0_19, %c0_20, %c0_21], %23 {strides = array<i32>} : memref<1x32x1xf32, #tpu.memory_space<vmem>>, vector<1x32x1xf32>,
      %c0_22 = arith.constant 0 : index
      %c0_23 = arith.constant 0 : index
      %24 = vector.load %arg8[%c0_22, %c0_23] : memref<32x256xf32, #tpu.memory_space<vmem>>, vector<32x256xf32>
      %cst_24 = arith.constant dense<0.000000e+00> : vector<32xf32>
      %25 = vector.multi_reduction <add>, %24, %cst_24 [1] : vector<32x256xf32> to vector<32xf32>
      %26 = vector.shape_cast %25 : vector<32xf32> to vector<32x1xf32>
      %c0_25 = arith.constant 0 : index
      %c0_26 = arith.constant 0 : index
      %c0_27 = arith.constant 0 : index
      %27 = vector.load %arg6[%c0_25, %c0_26, %c0_27] : memref<1x32x1xf32, #tpu.memory_space<vmem>>, vector<1x32x1xf32>
      %28 = vector.shape_cast %27 : vector<1x32x1xf32> to vector<32x1xf32>
      %29 = vector.shape_cast %26 : vector<32x1xf32> to vector<1x32x1xf32>
      tpu.vector_store %arg6[%c0_25, %c0_26, %c0_27], %29 {strides = array<i32>} : memref<1x32x1xf32, #tpu.memory_space<vmem>>, vector<1x32x1xf32>,
    } else {
    }
    return
  }
  func.func @transform_0(%arg0: i32, %arg1: i32) -> (i32, i32) {
    %c0_i32 = arith.constant 0 : i32
    %c0_i32_0 = arith.constant 0 : i32
    %c0_i32_1 = arith.constant 0 : i32
    return %c0_i32, %c0_i32_0 : i32, i32
  }
  func.func @transform_1(%arg0: i32, %arg1: i32) -> (i32, i32) {
    %c1_i32 = arith.constant 1 : i32
    %0 = arith.muli %arg0, %c1_i32 : i32
    %1 = arith.addi %0, %arg1 : i32
    %c0_i32 = arith.constant 0 : i32
    %c0_i32_0 = arith.constant 0 : i32
    return %c0_i32, %1 : i32, i32
  }
  func.func @transform_2(%arg0: i32, %arg1: i32) -> (i32, i32) {
    %c1_i32 = arith.constant 1 : i32
    %0 = arith.muli %arg0, %c1_i32 : i32
    %1 = arith.addi %0, %arg1 : i32
    %c0_i32 = arith.constant 0 : i32
    %c0_i32_0 = arith.constant 0 : i32
    return %c0_i32, %1 : i32, i32
  }
  func.func @transform_3(%arg0: i32, %arg1: i32) -> (i32, i32, i32) {
    %c0_i32 = arith.constant 0 : i32
    %c0_i32_0 = arith.constant 0 : i32
    %c0_i32_1 = arith.constant 0 : i32
    return %arg0, %c0_i32, %c0_i32_0 : i32, i32, i32
  }
  func.func @transform_4(%arg0: i32, %arg1: i32) -> (i32, i32, i32) {
    %c0_i32 = arith.constant 0 : i32
    %c0_i32_0 = arith.constant 0 : i32
    %c0_i32_1 = arith.constant 0 : i32
    return %arg0, %c0_i32, %c0_i32_0 : i32, i32, i32
  }
}

module attributes {stable_mosaic.version = 11 : i64} {
  func.func @_bn_lrelu_kernel(%arg0: i32, %arg1: memref<32x256xbf16, #tpu.memory_space<vmem>>, %arg2: memref<32x1xf32, #tpu.memory_space<vmem>>, %arg3: memref<32x1xf32, #tpu.memory_space<vmem>>, %arg4: memref<32x256xbf16, #tpu.memory_space<vmem>>) attributes {dimension_semantics = [#tpu.dimension_semantics<parallel>], iteration_bounds = array<i64: 2>, scalar_prefetch = 0 : i64, scratch_operands = 0 : i64, tpu.core_type = #tpu.core_type<tc>, window_params = [{transform_indices = @transform_0, window_bounds = array<i64: 32, 256>}, {pipeline_mode = #tpu.pipeline_mode<synchronous>, transform_indices = @transform_1, window_bounds = array<i64: 32, 1>}, {pipeline_mode = #tpu.pipeline_mode<synchronous>, transform_indices = @transform_2, window_bounds = array<i64: 32, 1>}, {transform_indices = @transform_3, window_bounds = array<i64: 32, 256>}]} {
    %c0 = arith.constant 0 : index
    %c0_0 = arith.constant 0 : index
    %0 = vector.load %arg1[%c0, %c0_0] : memref<32x256xbf16, #tpu.memory_space<vmem>>, vector<32x256xbf16>
    %1 = arith.extf %0 : vector<32x256xbf16> to vector<32x256xf32>
    %c0_1 = arith.constant 0 : index
    %c0_2 = arith.constant 0 : index
    %2 = vector.load %arg2[%c0_1, %c0_2] : memref<32x1xf32, #tpu.memory_space<vmem>>, vector<32x1xf32>
    %3 = vector.broadcast %2 : vector<32x1xf32> to vector<32x256xf32>
    %4 = arith.mulf %1, %3 : vector<32x256xf32>
    %c0_3 = arith.constant 0 : index
    %c0_4 = arith.constant 0 : index
    %5 = vector.load %arg3[%c0_3, %c0_4] : memref<32x1xf32, #tpu.memory_space<vmem>>, vector<32x1xf32>
    %6 = vector.broadcast %5 : vector<32x1xf32> to vector<32x256xf32>
    %7 = arith.addf %4, %6 : vector<32x256xf32>
    %cst = arith.constant 0.000000e+00 : f32
    %8 = vector.broadcast %cst : f32 to vector<32x256xf32>
    %9 = arith.cmpf ogt, %7, %8 : vector<32x256xf32>
    %cst_5 = arith.constant 0.00999999977 : f32
    %10 = vector.broadcast %cst_5 : f32 to vector<32x256xf32>
    %11 = arith.mulf %10, %7 : vector<32x256xf32>
    %12 = arith.select %9, %7, %11 : vector<32x256xi1>, vector<32x256xf32>
    %13 = arith.truncf %12 : vector<32x256xf32> to vector<32x256xbf16>
    %c0_6 = arith.constant 0 : index
    %c0_7 = arith.constant 0 : index
    %14 = vector.load %arg4[%c0_6, %c0_7] : memref<32x256xbf16, #tpu.memory_space<vmem>>, vector<32x256xbf16>
    tpu.vector_store %arg4[%c0_6, %c0_7], %13 {strides = array<i32>} : memref<32x256xbf16, #tpu.memory_space<vmem>>, vector<32x256xbf16>,
    return
  }
  func.func @transform_0(%arg0: i32) -> (i32, i32) {
    %c0_i32 = arith.constant 0 : i32
    %c0_i32_0 = arith.constant 0 : i32
    return %c0_i32, %arg0 : i32, i32
  }
  func.func @transform_1(%arg0: i32) -> (i32, i32) {
    %c0_i32 = arith.constant 0 : i32
    %c0_i32_0 = arith.constant 0 : i32
    %c0_i32_1 = arith.constant 0 : i32
    return %c0_i32, %c0_i32_0 : i32, i32
  }
  func.func @transform_2(%arg0: i32) -> (i32, i32) {
    %c0_i32 = arith.constant 0 : i32
    %c0_i32_0 = arith.constant 0 : i32
    %c0_i32_1 = arith.constant 0 : i32
    return %c0_i32, %c0_i32_0 : i32, i32
  }
  func.func @transform_3(%arg0: i32) -> (i32, i32) {
    %c0_i32 = arith.constant 0 : i32
    %c0_i32_0 = arith.constant 0 : i32
    return %c0_i32, %arg0 : i32, i32
  }
}

module attributes {stable_mosaic.version = 11 : i64} {
  func.func @_conv_stats_kernel(%arg0: i32, %arg1: i32, %arg2: memref<32x288xbf16, #tpu.memory_space<vmem>>, %arg3: memref<288x256xbf16, #tpu.memory_space<vmem>>, %arg4: memref<32x256xbf16, #tpu.memory_space<vmem>>, %arg5: memref<1x32x1xf32, #tpu.memory_space<vmem>>, %arg6: memref<1x32x1xf32, #tpu.memory_space<vmem>>, %arg7: memref<32x256xf32, #tpu.memory_space<vmem>>, %arg8: memref<32x256xf32, #tpu.memory_space<vmem>>) attributes {dimension_semantics = [#tpu.dimension_semantics<parallel>, #tpu.dimension_semantics<arbitrary>], iteration_bounds = array<i64: 2, 1>, scalar_prefetch = 0 : i64, scratch_operands = 2 : i64, tpu.core_type = #tpu.core_type<tc>, window_params = [{pipeline_mode = #tpu.pipeline_mode<synchronous>, transform_indices = @transform_0, window_bounds = array<i64: 32, 288>}, {transform_indices = @transform_1, window_bounds = array<i64: 288, 256>}, {transform_indices = @transform_2, window_bounds = array<i64: 32, 256>}, {transform_indices = @transform_3, window_bounds = array<i64: 1, 32, 1>}, {transform_indices = @transform_4, window_bounds = array<i64: 1, 32, 1>}]} {
    %c0_i32 = arith.constant 0 : i32
    %0 = arith.cmpi eq, %arg1, %c0_i32 : i32
    %1 = arith.extui %0 : i1 to i32
    %c0_i32_0 = arith.constant 0 : i32
    %2 = arith.cmpi ne, %1, %c0_i32_0 : i32
    scf.if %2 {
      %cst_16 = arith.constant 0.000000e+00 : f32
      %18 = vector.broadcast %cst_16 : f32 to vector<32x256xf32>
      %c0_17 = arith.constant 0 : index
      %c0_18 = arith.constant 0 : index
      %19 = vector.load %arg7[%c0_17, %c0_18] : memref<32x256xf32, #tpu.memory_space<vmem>>, vector<32x256xf32>
      tpu.vector_store %arg7[%c0_17, %c0_18], %18 {strides = array<i32>} : memref<32x256xf32, #tpu.memory_space<vmem>>, vector<32x256xf32>,
      %cst_19 = arith.constant 0.000000e+00 : f32
      %20 = vector.broadcast %cst_19 : f32 to vector<32x256xf32>
      %c0_20 = arith.constant 0 : index
      %c0_21 = arith.constant 0 : index
      %21 = vector.load %arg8[%c0_20, %c0_21] : memref<32x256xf32, #tpu.memory_space<vmem>>, vector<32x256xf32>
      tpu.vector_store %arg8[%c0_20, %c0_21], %20 {strides = array<i32>} : memref<32x256xf32, #tpu.memory_space<vmem>>, vector<32x256xf32>,
    } else {
    }
    %c0 = arith.constant 0 : index
    %c0_1 = arith.constant 0 : index
    %3 = vector.load %arg2[%c0, %c0_1] : memref<32x288xbf16, #tpu.memory_space<vmem>>, vector<32x288xbf16>
    %c0_2 = arith.constant 0 : index
    %c0_3 = arith.constant 0 : index
    %4 = vector.load %arg3[%c0_2, %c0_3] : memref<288x256xbf16, #tpu.memory_space<vmem>>, vector<288x256xbf16>
    %cst = arith.constant dense<0.000000e+00> : vector<32x256xf32>
    %5 = tpu.matmul %3, %4, %cst {dimension_numbers = #tpu.dot_dimension_numbers<[1], [0], [0], [1], [0, 0, 1, 1], [], []>} : vector<32x288xbf16>, vector<288x256xbf16>, vector<32x256xf32> -> vector<32x256xf32>
    %6 = arith.truncf %5 : vector<32x256xf32> to vector<32x256xbf16>
    %c0_4 = arith.constant 0 : index
    %c0_5 = arith.constant 0 : index
    %7 = vector.load %arg4[%c0_4, %c0_5] : memref<32x256xbf16, #tpu.memory_space<vmem>>, vector<32x256xbf16>
    tpu.vector_store %arg4[%c0_4, %c0_5], %6 {strides = array<i32>} : memref<32x256xbf16, #tpu.memory_space<vmem>>, vector<32x256xbf16>,
    %c0_6 = arith.constant 0 : index
    %c0_7 = arith.constant 0 : index
    %8 = vector.load %arg7[%c0_6, %c0_7] : memref<32x256xf32, #tpu.memory_space<vmem>>, vector<32x256xf32>
    %9 = arith.addf %8, %5 : vector<32x256xf32>
    %c0_8 = arith.constant 0 : index
    %c0_9 = arith.constant 0 : index
    %10 = vector.load %arg7[%c0_8, %c0_9] : memref<32x256xf32, #tpu.memory_space<vmem>>, vector<32x256xf32>
    tpu.vector_store %arg7[%c0_8, %c0_9], %9 {strides = array<i32>} : memref<32x256xf32, #tpu.memory_space<vmem>>, vector<32x256xf32>,
    %c0_10 = arith.constant 0 : index
    %c0_11 = arith.constant 0 : index
    %11 = vector.load %arg8[%c0_10, %c0_11] : memref<32x256xf32, #tpu.memory_space<vmem>>, vector<32x256xf32>
    %12 = arith.mulf %5, %5 : vector<32x256xf32>
    %13 = arith.addf %11, %12 : vector<32x256xf32>
    %c0_12 = arith.constant 0 : index
    %c0_13 = arith.constant 0 : index
    %14 = vector.load %arg8[%c0_12, %c0_13] : memref<32x256xf32, #tpu.memory_space<vmem>>, vector<32x256xf32>
    tpu.vector_store %arg8[%c0_12, %c0_13], %13 {strides = array<i32>} : memref<32x256xf32, #tpu.memory_space<vmem>>, vector<32x256xf32>,
    %c0_i32_14 = arith.constant 0 : i32
    %15 = arith.cmpi eq, %arg1, %c0_i32_14 : i32
    %16 = arith.extui %15 : i1 to i32
    %c0_i32_15 = arith.constant 0 : i32
    %17 = arith.cmpi ne, %16, %c0_i32_15 : i32
    scf.if %17 {
      %c0_16 = arith.constant 0 : index
      %c0_17 = arith.constant 0 : index
      %18 = vector.load %arg7[%c0_16, %c0_17] : memref<32x256xf32, #tpu.memory_space<vmem>>, vector<32x256xf32>
      %cst_18 = arith.constant dense<0.000000e+00> : vector<32xf32>
      %19 = vector.multi_reduction <add>, %18, %cst_18 [1] : vector<32x256xf32> to vector<32xf32>
      %20 = vector.shape_cast %19 : vector<32xf32> to vector<32x1xf32>
      %c0_19 = arith.constant 0 : index
      %c0_20 = arith.constant 0 : index
      %c0_21 = arith.constant 0 : index
      %21 = vector.load %arg5[%c0_19, %c0_20, %c0_21] : memref<1x32x1xf32, #tpu.memory_space<vmem>>, vector<1x32x1xf32>
      %22 = vector.shape_cast %21 : vector<1x32x1xf32> to vector<32x1xf32>
      %23 = vector.shape_cast %20 : vector<32x1xf32> to vector<1x32x1xf32>
      tpu.vector_store %arg5[%c0_19, %c0_20, %c0_21], %23 {strides = array<i32>} : memref<1x32x1xf32, #tpu.memory_space<vmem>>, vector<1x32x1xf32>,
      %c0_22 = arith.constant 0 : index
      %c0_23 = arith.constant 0 : index
      %24 = vector.load %arg8[%c0_22, %c0_23] : memref<32x256xf32, #tpu.memory_space<vmem>>, vector<32x256xf32>
      %cst_24 = arith.constant dense<0.000000e+00> : vector<32xf32>
      %25 = vector.multi_reduction <add>, %24, %cst_24 [1] : vector<32x256xf32> to vector<32xf32>
      %26 = vector.shape_cast %25 : vector<32xf32> to vector<32x1xf32>
      %c0_25 = arith.constant 0 : index
      %c0_26 = arith.constant 0 : index
      %c0_27 = arith.constant 0 : index
      %27 = vector.load %arg6[%c0_25, %c0_26, %c0_27] : memref<1x32x1xf32, #tpu.memory_space<vmem>>, vector<1x32x1xf32>
      %28 = vector.shape_cast %27 : vector<1x32x1xf32> to vector<32x1xf32>
      %29 = vector.shape_cast %26 : vector<32x1xf32> to vector<1x32x1xf32>
      tpu.vector_store %arg6[%c0_25, %c0_26, %c0_27], %29 {strides = array<i32>} : memref<1x32x1xf32, #tpu.memory_space<vmem>>, vector<1x32x1xf32>,
    } else {
    }
    return
  }
  func.func @transform_0(%arg0: i32, %arg1: i32) -> (i32, i32) {
    %c0_i32 = arith.constant 0 : i32
    %c0_i32_0 = arith.constant 0 : i32
    %c0_i32_1 = arith.constant 0 : i32
    return %c0_i32, %c0_i32_0 : i32, i32
  }
  func.func @transform_1(%arg0: i32, %arg1: i32) -> (i32, i32) {
    %c1_i32 = arith.constant 1 : i32
    %0 = arith.muli %arg0, %c1_i32 : i32
    %1 = arith.addi %0, %arg1 : i32
    %c0_i32 = arith.constant 0 : i32
    %c0_i32_0 = arith.constant 0 : i32
    return %c0_i32, %1 : i32, i32
  }
  func.func @transform_2(%arg0: i32, %arg1: i32) -> (i32, i32) {
    %c1_i32 = arith.constant 1 : i32
    %0 = arith.muli %arg0, %c1_i32 : i32
    %1 = arith.addi %0, %arg1 : i32
    %c0_i32 = arith.constant 0 : i32
    %c0_i32_0 = arith.constant 0 : i32
    return %c0_i32, %1 : i32, i32
  }
  func.func @transform_3(%arg0: i32, %arg1: i32) -> (i32, i32, i32) {
    %c0_i32 = arith.constant 0 : i32
    %c0_i32_0 = arith.constant 0 : i32
    %c0_i32_1 = arith.constant 0 : i32
    return %arg0, %c0_i32, %c0_i32_0 : i32, i32, i32
  }
  func.func @transform_4(%arg0: i32, %arg1: i32) -> (i32, i32, i32) {
    %c0_i32 = arith.constant 0 : i32
    %c0_i32_0 = arith.constant 0 : i32
    %c0_i32_1 = arith.constant 0 : i32
    return %arg0, %c0_i32, %c0_i32_0 : i32, i32, i32
  }
}

module attributes {stable_mosaic.version = 11 : i64} {
  func.func @_bn_lrelu_kernel(%arg0: i32, %arg1: memref<32x256xbf16, #tpu.memory_space<vmem>>, %arg2: memref<32x1xf32, #tpu.memory_space<vmem>>, %arg3: memref<32x1xf32, #tpu.memory_space<vmem>>, %arg4: memref<32x256xf32, #tpu.memory_space<vmem>>) attributes {dimension_semantics = [#tpu.dimension_semantics<parallel>], iteration_bounds = array<i64: 2>, scalar_prefetch = 0 : i64, scratch_operands = 0 : i64, tpu.core_type = #tpu.core_type<tc>, window_params = [{transform_indices = @transform_0, window_bounds = array<i64: 32, 256>}, {pipeline_mode = #tpu.pipeline_mode<synchronous>, transform_indices = @transform_1, window_bounds = array<i64: 32, 1>}, {pipeline_mode = #tpu.pipeline_mode<synchronous>, transform_indices = @transform_2, window_bounds = array<i64: 32, 1>}, {transform_indices = @transform_3, window_bounds = array<i64: 32, 256>}]} {
    %c0 = arith.constant 0 : index
    %c0_0 = arith.constant 0 : index
    %0 = vector.load %arg1[%c0, %c0_0] : memref<32x256xbf16, #tpu.memory_space<vmem>>, vector<32x256xbf16>
    %1 = arith.extf %0 : vector<32x256xbf16> to vector<32x256xf32>
    %c0_1 = arith.constant 0 : index
    %c0_2 = arith.constant 0 : index
    %2 = vector.load %arg2[%c0_1, %c0_2] : memref<32x1xf32, #tpu.memory_space<vmem>>, vector<32x1xf32>
    %3 = vector.broadcast %2 : vector<32x1xf32> to vector<32x256xf32>
    %4 = arith.mulf %1, %3 : vector<32x256xf32>
    %c0_3 = arith.constant 0 : index
    %c0_4 = arith.constant 0 : index
    %5 = vector.load %arg3[%c0_3, %c0_4] : memref<32x1xf32, #tpu.memory_space<vmem>>, vector<32x1xf32>
    %6 = vector.broadcast %5 : vector<32x1xf32> to vector<32x256xf32>
    %7 = arith.addf %4, %6 : vector<32x256xf32>
    %cst = arith.constant 0.000000e+00 : f32
    %8 = vector.broadcast %cst : f32 to vector<32x256xf32>
    %9 = arith.cmpf ogt, %7, %8 : vector<32x256xf32>
    %cst_5 = arith.constant 0.00999999977 : f32
    %10 = vector.broadcast %cst_5 : f32 to vector<32x256xf32>
    %11 = arith.mulf %10, %7 : vector<32x256xf32>
    %12 = arith.select %9, %7, %11 : vector<32x256xi1>, vector<32x256xf32>
    %c0_6 = arith.constant 0 : index
    %c0_7 = arith.constant 0 : index
    %13 = vector.load %arg4[%c0_6, %c0_7] : memref<32x256xf32, #tpu.memory_space<vmem>>, vector<32x256xf32>
    tpu.vector_store %arg4[%c0_6, %c0_7], %12 {strides = array<i32>} : memref<32x256xf32, #tpu.memory_space<vmem>>, vector<32x256xf32>,
    return
  }
  func.func @transform_0(%arg0: i32) -> (i32, i32) {
    %c0_i32 = arith.constant 0 : i32
    %c0_i32_0 = arith.constant 0 : i32
    return %c0_i32, %arg0 : i32, i32
  }
  func.func @transform_1(%arg0: i32) -> (i32, i32) {
    %c0_i32 = arith.constant 0 : i32
    %c0_i32_0 = arith.constant 0 : i32
    %c0_i32_1 = arith.constant 0 : i32
    return %c0_i32, %c0_i32_0 : i32, i32
  }
  func.func @transform_2(%arg0: i32) -> (i32, i32) {
    %c0_i32 = arith.constant 0 : i32
    %c0_i32_0 = arith.constant 0 : i32
    %c0_i32_1 = arith.constant 0 : i32
    return %c0_i32, %c0_i32_0 : i32, i32
  }
  func.func @transform_3(%arg0: i32) -> (i32, i32) {
    %c0_i32 = arith.constant 0 : i32
    %c0_i32_0 = arith.constant 0 : i32
    return %c0_i32, %arg0 : i32, i32
  }
}

</mosaic_0001>

<bundles_post_ra>
// kernel: _lambda_.7
= control target key start
LH: loop header
LB: loop body
LE: loop exit
PB: predicated region body
PF: predicated region fallthrough
CT: control target
= control target key end

     0   :  { %s465_s12 = smov 0   ;;  %s467_s13 = smov 0   ;;  %s537_s0 = inlined_call_operand.vmem [shape: bf16[16,512], index: 0, kind: input, shape index: {}]   ;;  %s538_s1 = inlined_call_operand.vmem [shape: f32[16,1], index: 1, kind: input, shape index: {}]   ;;  %s539_s2 = inlined_call_operand.vmem [shape: f32[16,1], index: 2, kind: input, shape index: {}]   ;;  %s540_s3 = inlined_call_operand.vmem [shape: bf16[16,512], index: 3, kind: output, shape index: {}]  }
   0x1   :  { %s469_s14 = smov 0  }
   0x2 LB: > { %s372_s15 = sadd.s32 4294967295, %s442_s14   ;;  %s482_s16 = sadd.s32 1, %s442_s14   ;;  %s442_s14 = sphi %s469_s14, %s544_s14   ;;  %s438_s13 = sphi %s467_s13, %s543_s13   ;;  %s434_s12 = sphi %s465_s12, %s542_s12  }
   0x3   : > { %s17_s17 = ssub.s32 %s442_s14, %s482_s16  ;;  %s20_s18 = sadd.s32 1, %s438_s13 }
   0x4   : > { %p18_p0 = scmp.eq.s32.totalorder %s17_s17, 0  ;;  %p27_p1 = scmp.ne.s32.totalorder %s438_s13, %s434_s12 }
   0x5   : > { %p28_p2 = scmp.eq.s32.totalorder %s442_s14, 0  ;;  %p99_p3 = scmp.eq.s32.totalorder %s372_s15, 1 }
   0x6   : > { %s493_s19 = scalar_select %p18_p0, %s438_s13, %s20_s18  }
   0x7   : > { %p29_p4 = por %p28_p2, %p27_p1  ;;  %p495_p5 = por %p99_p3, %p27_p1 }
   0x8   : > { %p375_p6 = scmp.ge.s32.totalorder %s442_s14, 2 }
   0xa   : > { %127 = sbr.rel (%p375_p6) target bundleno = 24 (0x18), region = 24 }
  0x11   : > { %130 = sbr.rel (!%p29_p4) target bundleno = 24 (0x18), region = 28  ;;  %s132_s21 = sand.u32 (%p29_p4), 1, %s438_s13  }
  0x12   : > { %s389_s22 = sshll.u32 (%p29_p4), %s442_s14, 3  ;;  %s376_s23 = sshll.u32 (%p29_p4), %s132_s21, 4 }
  0x13   : > { %s137_s26 = scalar_lea.vmem (%p29_p4), %s537_s0, %s389_s22  ;;  %s134_s27 = scalar_lea.vmem (%p29_p4), [#allocation2], %s376_s23 }
  0x14   : > { %v167_v0 = vld [vmem:[%s137_s26] sm:$0xff] (%p29_p4)  ;;  %v169_v1 = vld [vmem:[%s137_s26 + $0x10] sm:$0xff] (%p29_p4) }
  0x15   : > { %168 = vst [vmem:[%s134_s27] sm:$0xff] (%p29_p4), %v167_v0  ;;  %170 = vst [vmem:[%s134_s27 + $0x8] sm:$0xff] (%p29_p4), %v169_v1 }
  0x18 PF: > { %p379_p7 = scmp.ge.s32.totalorder %s442_s14, 1  ;;  %p175_p8 = scmp.lt.s32.totalorder %s442_s14, 3 }
  0x1a   : > { %p176_p9 = pnand %p379_p7, %p175_p8 }
  0x1b   : > { %v228_v2 = vld [vmem:[%s539_s2] sm:$0xff] (!%p176_p9)  ;;  %v444_v4 = vmov (!%p176_p9), 0   ;;  %v229_v5 = vld [vmem:[%s539_s2 + $0x8] sm:$0xff] (!%p176_p9)  ;;  %s182_s9 = sand.u32 (!%p176_p9), 1, %s434_s12  }
  0x1c   : > { %179 = sbr.rel (%p176_p9) target bundleno = 180 (0xb4), region = 66  ;;  %v212_v3 = vld [vmem:[%s538_s1] sm:$0xff] (!%p176_p9)  ;;  %419 = vset.pattern.permute.xlu1 (!%p176_p9), %v444_v4  ;;  %418 = vset.pattern.permute.xlu0 (!%p176_p9), %v444_v4  ;;  %v213_v6 = vld [vmem:[%s538_s1 + $0x8] sm:$0xff] (!%p176_p9)  ;;  %s380_s10 = sshll.u32 (!%p176_p9), %s182_s9, 4 }
  0x1d   : > { %232 = vperm.xlu1 (!%p176_p9), %419, %v228_v2   ;;  %216 = vperm.xlu0 (!%p176_p9), %418, %v212_v3   ;;  %s184_s11 = scalar_lea.vmem (!%p176_p9), [#allocation2], %s380_s10  ;;  %s203_s12 = scalar_lea.vmem (!%p176_p9), [#allocation3], %s380_s10 }
  0x1e   : > { %v206_v7 = vld [vmem:[%s184_s11] sm:$0xff] (!%p176_p9)  ;;  %v207_v10 = vld [vmem:[%s184_s11 + $0x8] sm:$0xff] (!%p176_p9) }
  0x1f   : > { %v208_v8 = vunpack.c.l.bf16 (!%p176_p9), %v206_v7  ;;  %v209_v9 = vunpack.c.h.bf16 (!%p176_p9), %v206_v7  ;;  %v210_v15 = vunpack.c.l.bf16 (!%p176_p9), %v207_v10  ;;  %v211_v16 = vunpack.c.h.bf16 (!%p176_p9), %v207_v10 }
  0x21   : > { %237 = vperm.xlu1 (!%p176_p9), %419, %v229_v5   ;;  %221 = vperm.xlu0 (!%p176_p9), %418, %v213_v6  }
  0x23   : > { %s392_s17 = sshll.u32 (%p495_p5), %s372_s15, 3 }
  0x24   : > { %s279_s22 = scalar_lea.vmem (%p495_p5), %s540_s3, %s392_s17 }
  0x9c   : > { %v217_v11 = vpop.permute.xlu0 %216  ;;  %v233_v12 = vpop.permute.xlu1 %232 }
  0x9d   : > { %v224_v13 = vmul.f32 %v217_v11, %v208_v8  ;;  %v225_v14 = vmul.f32 %v217_v11, %v209_v9 }
  0x9f   : > { %v240_v17 = vadd.f32 %v233_v12, %v224_v13  ;;  %v241_v18 = vadd.f32 %v233_v12, %v225_v14 }
  0xa0   : > { %v222_v19 = vpop.permute.xlu0 %221  ;;  %v238_v26 = vpop.permute.xlu1 %237 }
  0xa1   : > { %vm244_vm0 = vcmp.gt.f32.partialorder %v240_v17, 0.0  ;;  %vm245_vm1 = vcmp.gt.f32.partialorder %v241_v18, 0.0  ;;  %v248_v20 = vmul.f32 0.01, %v240_v17  ;;  %v249_v21 = vmul.f32 0.01, %v241_v18 }
  0xa2   : > { %v226_v22 = vmul.f32 %v222_v19, %v210_v15  ;;  %v227_v23 = vmul.f32 %v222_v19, %v211_v16 }
  0xa3   : > { %v252_v24 = vsel %vm244_vm0, %v240_v17, %v248_v20  ;;  %v253_v25 = vsel %vm245_vm1, %v241_v18, %v249_v21 }
  0xa4   : > { %v390_v27 = vpack.c.bf16 %v253_v25, %v252_v24  ;;  %v242_v28 = vadd.f32 %v238_v26, %v226_v22  ;;  %v243_v29 = vadd.f32 %v238_v26, %v227_v23 }
  0xa5   : > { %276 = sbr.rel (!%p495_p5) target bundleno = 180 (0xb4), region = 74 }
  0xa6   : > { %268 = vst [vmem:[%s203_s12] sm:$0xff] %v390_v27  ;;  %vm246_vm2 = vcmp.gt.f32.partialorder %v242_v28, 0.0  ;;  %vm247_vm3 = vcmp.gt.f32.partialorder %v243_v29, 0.0  ;;  %v250_v30 = vmul.f32 0.01, %v242_v28  ;;  %v251_v31 = vmul.f32 0.01, %v243_v29 }
  0xa8   : > { %v254_v32 = vsel %vm246_vm2, %v242_v28, %v250_v30  ;;  %v255_v33 = vsel %vm247_vm3, %v243_v29, %v251_v31 }
  0xa9   : > { %v391_v34 = vpack.c.bf16 %v255_v33, %v254_v32 }
  0xab   : > { %269 = vst [vmem:[%s203_s12 + $0x8] sm:$0xff] %v391_v34 }
  0xad   : > { %v309_v35 = vld [vmem:[%s203_s12] sm:$0xff] }
  0xae   : > { %310 = vst [vmem:[%s279_s22] sm:$0xff] %v309_v35 }
  0xb2   : > { %v311_v36 = vld [vmem:[%s203_s12 + $0x8] sm:$0xff] }
  0xb3   : > { %312 = vst [vmem:[%s279_s22 + $0x10] sm:$0xff] %v311_v36 }
  0xb4 PF: > { %p10_p10 = scmp.ge.s32.totalorder %s482_s16, 4   ;;  %s542_s12 = smov %s438_s13 }
  0xb5   : > { %s543_s13 = smov %s493_s19  ;;  %s544_s14 = smov %s482_s16 }
  0xb6   :  { %12 = sbr.rel (!%p10_p10) target bundleno = 2 (0x2), region = 143 }

// kernel: _lambda_.6
= control target key start
LH: loop header
LB: loop body
LE: loop exit
PB: predicated region body
PF: predicated region fallthrough
CT: control target
= control target key end

     0   :  { %s1123_s15 = smov 0   ;;  %s1125_s16 = smov 0   ;;  %s1315_s0 = inlined_call_operand.vmem [shape: bf16[16,256], index: 0, kind: input, shape index: {}]   ;;  %s1316_s1 = inlined_call_operand.vmem [shape: bf16[256,512], index: 1, kind: input, shape index: {}]   ;;  %s1317_s2 = inlined_call_operand.vmem [shape: bf16[16,512], index: 2, kind: output, shape index: {0}]   ;;  %s1318_s3 = inlined_call_operand.vmem [shape: f32[2,16,1], index: 3, kind: output, shape index: {1}]   ;;  %s1319_s4 = inlined_call_operand.vmem [shape: f32[2,16,1], index: 4, kind: output, shape index: {2}]  }
   0x1   :  { %s1127_s17 = smov 0   ;;  %s1129_s18 = smov 0  }
   0x2   :  { %s1131_s19 = smov 0  }
   0x3 LB: > { %s27_s20 = sadd.s32 1, %s1092_s18  ;;  %s906_s21 = sadd.s32 4294967295, %s1096_s19   ;;  %s1096_s19 = sphi %s1131_s19, %s15_s19   ;;  %s1092_s18 = sphi %s1129_s18, %s1324_s18   ;;  %s1088_s17 = sphi %s1127_s17, %s1323_s17   ;;  %s1084_s16 = sphi %s1125_s16, %s1322_s16   ;;  %s1080_s15 = sphi %s1123_s15, %s1321_s15  }
   0x4   : > { %p29_p0 = scmp.ge.s32.totalorder %s27_s20, 2  ;;  %p64_p1 = scmp.ne.s32.totalorder %s1084_s16, %s1080_s15 }
   0x5   : > { %p65_p2 = scmp.eq.s32.totalorder %s1096_s19, 0  ;;  %p96_p4 = scmp.eq.s32.totalorder %s906_s21, 1 }
   0x6   : > { %s1326_s20 = smov (%p29_p0, %s27_s20), 0  ;;  %s57_s23 = sadd.s32 1, %s1084_s16 }
   0x7   : > { %p66_p3 = por %p65_p2, %p64_p1  ;;  %s54_s22 = ssub.s32 %s1092_s18, %s1326_s20 }
   0x8   : > { %p55_p5 = scmp.eq.s32.totalorder %s54_s22, 0  ;;  %p1158_p6 = por %p96_p4, %p64_p1 }
   0x9   : > { %p909_p7 = scmp.ge.s32.totalorder %s1096_s19, 2 }
   0xa   : > { %s1163_s25 = scalar_select %p55_p5, %s1084_s16, %s57_s23  }
   0xb   : > { %173 = sbr.rel (%p909_p7) target bundleno = 38 (0x26), region = 20 }
  0x12   : > { %176 = sbr.rel (!%p66_p3) target bundleno = 38 (0x26), region = 24  ;;  %s178_s26 = sand.u32 (%p66_p3), 1, %s1084_s16  }
  0x13   : > { %s961_s27 = sshll.u32 (%p66_p3), %s1092_s18, 3  ;;  %s910_s28 = sshll.u32 (%p66_p3), %s178_s26, 8 }
  0x14   : > { %s1171_s5 = scalar_lea.vmem (%p66_p3), %s1316_s1, %s961_s27  ;;  %s1176_s6 = scalar_lea.vmem (%p66_p3), [#allocation4], %s910_s28 }
  0x15   : > { %v274_v0 = vld [vmem:[%s1171_s5] sm:$0xff] (%p66_p3)  ;;  %v276_v1 = vld [vmem:[%s1171_s5 + $0x10] sm:$0xff] (%p66_p3) }
  0x16   : > { %v278_v2 = vld [vmem:[%s1171_s5 + $0x20] sm:$0xff] (%p66_p3)  ;;  %275 = vst [vmem:[%s1176_s6] sm:$0xff] (%p66_p3), %v274_v0  ;;  %277 = vst [vmem:[%s1176_s6 + $0x8] sm:$0xff] (%p66_p3), %v276_v1  ;;  %v280_v3 = vld [vmem:[%s1171_s5 + $0x30] sm:$0xff] (%p66_p3) }
  0x17   : > { %279 = vst [vmem:[%s1176_s6 + $0x10] sm:$0xff] (%p66_p3), %v278_v2  ;;  %v282_v4 = vld [vmem:[%s1171_s5 + $0x40] sm:$0xff] (%p66_p3)  ;;  %v284_v5 = vld [vmem:[%s1171_s5 + $0x50] sm:$0xff] (%p66_p3)  ;;  %281 = vst [vmem:[%s1176_s6 + $0x18] sm:$0xff] (%p66_p3), %v280_v3 }
  0x18   : > { %283 = vst [vmem:[%s1176_s6 + $0x20] sm:$0xff] (%p66_p3), %v282_v4  ;;  %285 = vst [vmem:[%s1176_s6 + $0x28] sm:$0xff] (%p66_p3), %v284_v5  ;;  %v286_v6 = vld [vmem:[%s1171_s5 + $0x60] sm:$0xff] (%p66_p3)  ;;  %v288_v7 = vld [vmem:[%s1171_s5 + $0x70] sm:$0xff] (%p66_p3) }
  0x19   : > { %v290_v8 = vld [vmem:[%s1171_s5 + $0x80] sm:$0xff]  ;;  %287 = vst [vmem:[%s1176_s6 + $0x30] sm:$0xff] %v286_v6  ;;  %289 = vst [vmem:[%s1176_s6 + $0x38] sm:$0xff] %v288_v7  ;;  %v292_v9 = vld [vmem:[%s1171_s5 + $0x90] sm:$0xff] }
  0x1a   : > { %291 = vst [vmem:[%s1176_s6 + $0x40] sm:$0xff] %v290_v8  ;;  %v294_v10 = vld [vmem:[%s1171_s5 + $0xa0] sm:$0xff]  ;;  %v296_v11 = vld [vmem:[%s1171_s5 + $0xb0] sm:$0xff]  ;;  %293 = vst [vmem:[%s1176_s6 + $0x48] sm:$0xff] %v292_v9 }
  0x1b   : > { %295 = vst [vmem:[%s1176_s6 + $0x50] sm:$0xff] %v294_v10  ;;  %297 = vst [vmem:[%s1176_s6 + $0x58] sm:$0xff] %v296_v11  ;;  %v298_v12 = vld [vmem:[%s1171_s5 + $0xc0] sm:$0xff]  ;;  %v300_v13 = vld [vmem:[%s1171_s5 + $0xd0] sm:$0xff] }
  0x1c   : > { %v302_v14 = vld [vmem:[%s1171_s5 + $0xe0] sm:$0xff]  ;;  %299 = vst [vmem:[%s1176_s6 + $0x60] sm:$0xff] %v298_v12  ;;  %301 = vst [vmem:[%s1176_s6 + $0x68] sm:$0xff] %v300_v13  ;;  %v304_v15 = vld [vmem:[%s1171_s5 + $0xf0] sm:$0xff] }
  0x1d   : > { %303 = vst [vmem:[%s1176_s6 + $0x70] sm:$0xff] %v302_v14  ;;  %v306_v16 = vld [vmem:[%s1171_s5 + $0x100] sm:$0xff]  ;;  %v308_v17 = vld [vmem:[%s1171_s5 + $0x110] sm:$0xff]  ;;  %305 = vst [vmem:[%s1176_s6 + $0x78] sm:$0xff] %v304_v15 }
  0x1e   : > { %307 = vst [vmem:[%s1176_s6 + $0x80] sm:$0xff] %v306_v16  ;;  %309 = vst [vmem:[%s1176_s6 + $0x88] sm:$0xff] %v308_v17  ;;  %v310_v18 = vld [vmem:[%s1171_s5 + $0x120] sm:$0xff]  ;;  %v312_v19 = vld [vmem:[%s1171_s5 + $0x130] sm:$0xff] }
  0x1f   : > { %v314_v20 = vld [vmem:[%s1171_s5 + $0x140] sm:$0xff]  ;;  %311 = vst [vmem:[%s1176_s6 + $0x90] sm:$0xff] %v310_v18  ;;  %313 = vst [vmem:[%s1176_s6 + $0x98] sm:$0xff] %v312_v19  ;;  %v316_v21 = vld [vmem:[%s1171_s5 + $0x150] sm:$0xff] }
  0x20   : > { %315 = vst [vmem:[%s1176_s6 + $0xa0] sm:$0xff] %v314_v20  ;;  %v318_v22 = vld [vmem:[%s1171_s5 + $0x160] sm:$0xff]  ;;  %v320_v23 = vld [vmem:[%s1171_s5 + $0x170] sm:$0xff]  ;;  %317 = vst [vmem:[%s1176_s6 + $0xa8] sm:$0xff] %v316_v21 }
  0x21   : > { %319 = vst [vmem:[%s1176_s6 + $0xb0] sm:$0xff] %v318_v22  ;;  %321 = vst [vmem:[%s1176_s6 + $0xb8] sm:$0xff] %v320_v23  ;;  %v322_v24 = vld [vmem:[%s1171_s5 + $0x180] sm:$0xff]  ;;  %v324_v25 = vld [vmem:[%s1171_s5 + $0x190] sm:$0xff] }
  0x22   : > { %v326_v26 = vld [vmem:[%s1171_s5 + $0x1a0] sm:$0xff]  ;;  %323 = vst [vmem:[%s1176_s6 + $0xc0] sm:$0xff] %v322_v24  ;;  %325 = vst [vmem:[%s1176_s6 + $0xc8] sm:$0xff] %v324_v25  ;;  %v328_v27 = vld [vmem:[%s1171_s5 + $0x1b0] sm:$0xff] }
  0x23   : > { %327 = vst [vmem:[%s1176_s6 + $0xd0] sm:$0xff] %v326_v26  ;;  %v330_v28 = vld [vmem:[%s1171_s5 + $0x1c0] sm:$0xff]  ;;  %v332_v29 = vld [vmem:[%s1171_s5 + $0x1d0] sm:$0xff]  ;;  %329 = vst [vmem:[%s1176_s6 + $0xd8] sm:$0xff] %v328_v27 }
  0x24   : > { %331 = vst [vmem:[%s1176_s6 + $0xe0] sm:$0xff] %v330_v28  ;;  %333 = vst [vmem:[%s1176_s6 + $0xe8] sm:$0xff] %v332_v29  ;;  %v334_v30 = vld [vmem:[%s1171_s5 + $0x1e0] sm:$0xff]  ;;  %v336_v31 = vld [vmem:[%s1171_s5 + $0x1f0] sm:$0xff] }
  0x25   : > { %335 = vst [vmem:[%s1176_s6 + $0xf0] sm:$0xff] %v334_v30  ;;  %337 = vst [vmem:[%s1176_s6 + $0xf8] sm:$0xff] %v336_v31 }
  0x26 PF: > { %p913_p8 = scmp.ge.s32.totalorder %s1096_s19, 1  ;;  %p342_p9 = scmp.lt.s32.totalorder %s1096_s19, 3 }
  0x28   : > { %p343_p10 = pnand %p913_p8, %p342_p9 }
  0x29   : > { %s349_s7 = sand.u32 (!%p343_p10), 1, %s1080_s15   ;;  %v1057_v32 = vld [vmem:[%s1315_s0 + $0x4] ss:$8 sps:$4 sm:$0xff] (!%p343_p10)   ;;  %v1055_v1 = vld [vmem:[%s1315_s0] ss:$8 sps:$4 sm:$0xff] (!%p343_p10)   ;;  %p387_p11 = scmp.lt.s32.totalorder (!%p343_p10), %s1088_s17, 1 }
  0x2a   : > { %346 = sbr.rel (%p343_p10) target bundleno = 473 (0x1d9), region = 62  ;;  %s914_s8 = sshll.u32 (!%p343_p10), %s349_s7, 8  ;;  %645 = vmatprep.mubr.bf16.mxu0 (!%p343_p10), %v1057_v32  ;;  %vm711_vm0 = vcmask (!%p343_p10), 7168  }
  0x2b   : > { %s1247_s11 = scalar_lea.vmem (!%p343_p10), [#allocation4], %s914_s8  ;;  %s915_s14 = sshll.u32 (!%p343_p10), %s349_s7, 4 }
  0x2c   : > { %v1007_v33 = vld [vmem:[%s1247_s11 + $0x4] ss:$8 sps:$4 sm:$0xff] (!%p343_p10)   ;;  %v1009_v34 = vld [vmem:[%s1247_s11] ss:$8 sps:$4 sm:$0xff] (!%p343_p10)   ;;  %v1010_v35 = vld [vmem:[%s1247_s11 + $0x14] ss:$8 sps:$4 sm:$0xff] (!%p343_p10)  }
  0x2d   : > { %613 = vmatprep.subr.bf16.mxu0 (!%p343_p10), %v1007_v33  ;;  %v1012_v36 = vld [vmem:[%s1247_s11 + $0x10] ss:$8 sps:$4 sm:$0xff] (!%p343_p10)   ;;  %v1013_v37 = vld [vmem:[%s1247_s11 + $0x24] ss:$8 sps:$4 sm:$0xff] (!%p343_p10)   ;;  %v1015_v38 = vld [vmem:[%s1247_s11 + $0x20] ss:$8 sps:$4 sm:$0xff] (!%p343_p10)  }
  0x2e   : > { %614 = vmatpush1.bf16.msra.mxu0 (!%p343_p10), %v1009_v34  ;;  %v1016_v39 = vld [vmem:[%s1247_s11 + $0x34] ss:$8 sps:$4 sm:$0xff] (!%p343_p10)   ;;  %v1018_v40 = vld [vmem:[%s1247_s11 + $0x30] ss:$8 sps:$4 sm:$0xff] (!%p343_p10)   ;;  %v1019_v41 = vld [vmem:[%s1247_s11 + $0x44] ss:$8 sps:$4 sm:$0xff] (!%p343_p10)  }
  0x2f   : > { %615 = vmatprep.subr.bf16.mxu0 (!%p343_p10), %v1010_v35  ;;  %v1021_v42 = vld [vmem:[%s1247_s11 + $0x40] ss:$8 sps:$4 sm:$0xff] (!%p343_p10)   ;;  %v1022_v43 = vld [vmem:[%s1247_s11 + $0x54] ss:$8 sps:$4 sm:$0xff] (!%p343_p10)   ;;  %v1024_v44 = vld [vmem:[%s1247_s11 + $0x50] ss:$8 sps:$4 sm:$0xff] (!%p343_p10)  }
  0x30   : > { %v1025_v45 = vld [vmem:[%s1247_s11 + $0x64] ss:$8 sps:$4 sm:$0xff] (!%p343_p10)   ;;  %v1027_v46 = vld [vmem:[%s1247_s11 + $0x60] ss:$8 sps:$4 sm:$0xff] (!%p343_p10)   ;;  %v1028_v47 = vld [vmem:[%s1247_s11 + $0x74] ss:$8 sps:$4 sm:$0xff] (!%p343_p10)  }
  0x31   : > { %v1030_v48 = vld [vmem:[%s1247_s11 + $0x70] ss:$8 sps:$4 sm:$0xff]   ;;  %v1031_v49 = vld [vmem:[%s1247_s11 + $0x84] ss:$8 sps:$4 sm:$0xff]   ;;  %v1033_v50 = vld [vmem:[%s1247_s11 + $0x80] ss:$8 sps:$4 sm:$0xff]  }
  0x32   : > { %616 = vmatpush1.bf16.msra.mxu0 %v1012_v36  ;;  %v1034_v51 = vld [vmem:[%s1247_s11 + $0x94] ss:$8 sps:$4 sm:$0xff]   ;;  %v1036_v52 = vld [vmem:[%s1247_s11 + $0x90] ss:$8 sps:$4 sm:$0xff]   ;;  %v1037_v53 = vld [vmem:[%s1247_s11 + $0xa4] ss:$8 sps:$4 sm:$0xff]  }
  0x33   : > { %617 = vmatprep.subr.bf16.mxu0 %v1013_v37  ;;  %v1039_v54 = vld [vmem:[%s1247_s11 + $0xa0] ss:$8 sps:$4 sm:$0xff]   ;;  %v1040_v55 = vld [vmem:[%s1247_s11 + $0xb4] ss:$8 sps:$4 sm:$0xff]   ;;  %v1042_v56 = vld [vmem:[%s1247_s11 + $0xb0] ss:$8 sps:$4 sm:$0xff]  }
  0x34   : > { %v1043_v57 = vld [vmem:[%s1247_s11 + $0xc4] ss:$8 sps:$4 sm:$0xff]   ;;  %v1045_v58 = vld [vmem:[%s1247_s11 + $0xc0] ss:$8 sps:$4 sm:$0xff]   ;;  %v1046_v59 = vld [vmem:[%s1247_s11 + $0xd4] ss:$8 sps:$4 sm:$0xff]  }
  0x35   : > { %v1048_v60 = vld [vmem:[%s1247_s11 + $0xd0] ss:$8 sps:$4 sm:$0xff]   ;;  %v1049_v61 = vld [vmem:[%s1247_s11 + $0xe4] ss:$8 sps:$4 sm:$0xff]   ;;  %v1051_v62 = vld [vmem:[%s1247_s11 + $0xe0] ss:$8 sps:$4 sm:$0xff]  }
  0x36   : > { %618 = vmatpush1.bf16.msra.mxu0 %v1015_v38  ;;  %v1052_v63 = vld [vmem:[%s1247_s11 + $0xf4] ss:$8 sps:$4 sm:$0xff]   ;;  %v1054_v0 = vld [vmem:[%s1247_s11 + $0xf0] ss:$8 sps:$4 sm:$0xff]   ;;  %s368_s21 = scalar_lea.vmem [#allocation5], %s915_s14  ;;  %s966_s5 = sshll.u32 (%p1158_p6), %s1088_s17, 3 }
  0x37   : > { %619 = vmatprep.subr.bf16.mxu0 %v1016_v39  ;;  %s388_s15 = scalar_select %p387_p11, %s1088_s17, 1 }
  0x38   : > { %s746_s8 = scalar_lea.vmem (%p1158_p6), %s1317_s2, %s966_s5 }
  0x39   : > { %s962_s22 = sshll.u32 %s388_s15, 4 }
  0x3a   : > { %620 = vmatpush1.bf16.msra.mxu0 %v1018_v40  ;;  %s391_s27 = scalar_lea.vmem %s1318_s3, %s962_s22  ;;  %s396_s30 = scalar_lea.vmem %s1319_s4, %s962_s22 }
  0x3b   : > { %621 = vmatprep.subr.bf16.mxu0 %v1019_v41 }
  0x3e   : > { %622 = vmatpush1.bf16.msra.mxu0 %v1021_v42 }
  0x3f   : > { %623 = vmatprep.subr.bf16.mxu0 %v1022_v43 }
  0x42   : > { %624 = vmatpush1.bf16.msra.mxu0 %v1024_v44 }
  0x43   : > { %625 = vmatprep.subr.bf16.mxu0 %v1025_v45 }
  0x46   : > { %626 = vmatpush1.bf16.msra.mxu0 %v1027_v46 }
  0x47   : > { %627 = vmatprep.subr.bf16.mxu0 %v1028_v47 }
  0x4a   : > { %628 = vmatpush1.bf16.msra.mxu0 %v1030_v48 }
  0x4b   : > { %629 = vmatprep.subr.bf16.mxu0 %v1031_v49 }
  0x4e   : > { %630 = vmatpush1.bf16.msra.mxu0 %v1033_v50 }
  0x4f   : > { %631 = vmatprep.subr.bf16.mxu0 %v1034_v51 }
  0x52   : > { %632 = vmatpush1.bf16.msra.mxu0 %v1036_v52 }
  0x53   : > { %633 = vmatprep.subr.bf16.mxu0 %v1037_v53 }
  0x56   : > { %634 = vmatpush1.bf16.msra.mxu0 %v1039_v54 }
  0x57   : > { %635 = vmatprep.subr.bf16.mxu0 %v1040_v55 }
  0x5a   : > { %636 = vmatpush1.bf16.msra.mxu0 %v1042_v56 }
  0x5b   : > { %637 = vmatprep.subr.bf16.mxu0 %v1043_v57 }
  0x5e   : > { %638 = vmatpush1.bf16.msra.mxu0 %v1045_v58 }
  0x5f   : > { %639 = vmatprep.subr.bf16.mxu0 %v1046_v59 }
  0x62   : > { %640 = vmatpush1.bf16.msra.mxu0 %v1048_v60 }
  0x63   : > { %641 = vmatprep.subr.bf16.mxu0 %v1049_v61 }
  0x66   : > { %642 = vmatpush1.bf16.msra.mxu0 %v1051_v62 }
  0x67   : > { %643 = vmatprep.subr.bf16.mxu0 %v1052_v63 }
  0x6a   : > { %644 = vmatpush1.bf16.msra.mxu0 %v1054_v0 }
  0x6d   : > { %646 = vmatmul.mubr.bf16.vlgmr.msra.gmra.mrb[0].mxu0 %v1055_v1 }
 0x140   : > { %v647_v2 = vpop.f32.mrb[0].mxu0 }
 0x141   : > { %v649_v3 = vpop.f32.mrb[1].mxu0  ;;  %v686_v4 = vmul.f32 %v647_v2, %v647_v2 }
 0x142   : > { %v964_v5 = vpack.c.bf16 %v649_v3, %v647_v2  ;;  %v651_v6 = vpop.f32.mrb[2].mxu0  ;;  %v705_v7 = vadd.f32 %v649_v3, %v647_v2  ;;  %v687_v8 = vmul.f32 %v649_v3, %v649_v3 }
 0x143   : > { %v653_v9 = vpop.f32.mrb[3].mxu0  ;;  %v688_v10 = vmul.f32 %v651_v6, %v651_v6 }
 0x144   : > { %v965_v11 = vpack.c.bf16 %v653_v9, %v651_v6  ;;  %668 = vst [vmem:[%s368_s21] sm:$0xff] %v964_v5  ;;  %v689_v12 = vmul.f32 %v653_v9, %v653_v9  ;;  %706 = vadd.xlane.f32.xlu0 %v705_v7  ;;  %v718_v13 = vadd.f32 %v687_v8, %v686_v4 }
 0x145   : > { %v708_v14 = vadd.f32 %v653_v9, %v651_v6 }
 0x146   : > { %669 = vst [vmem:[%s368_s21 + $0x8] sm:$0xff] %v965_v11  ;;  %719 = vadd.xlane.f32.xlu1 %v718_v13  ;;  %v721_v15 = vadd.f32 %v689_v12, %v688_v10 }
 0x148   : > { %709 = vadd.xlane.f32.xlu0 %v708_v14 }
 0x14a   : > { %722 = vadd.xlane.f32.xlu1 %v721_v15 }
 0x14b   : > { %v776_v20 = vld [vmem:[%s368_s21] sm:$0xff] (%p1158_p6) }
 0x14c   : > { %777 = vst [vmem:[%s746_s8] sm:$0xff] (%p1158_p6), %v776_v20 }
 0x14d   : > { %v778_v21 = vld [vmem:[%s368_s21 + $0x8] sm:$0xff] (%p1158_p6) }
 0x14e   : > { %779 = vst [vmem:[%s746_s8 + $0x10] sm:$0xff] (%p1158_p6), %v778_v21 }
 0x1d1   : > { %v707_v16 = vpop.xlane.xlu0 %706 }
 0x1d2   : > { %712 = vst.msk [vmem:[%s391_s27] sm:$0xff] %vm711_vm0, %v707_v16  ;;  %742 = sbr.rel (!%p1158_p6) target bundleno = 473 (0x1d9), region = 78 }
 0x1d3   : > { %v720_v17 = vpop.xlane.xlu1 %719 }
 0x1d4   : > { %724 = vst.msk [vmem:[%s396_s30] sm:$0xff] %vm711_vm0, %v720_v17 }
 0x1d5   : > { %v710_v18 = vpop.xlane.xlu0 %709 }
 0x1d6   : > { %713 = vst.msk [vmem:[%s391_s27 + $0x8] sm:$0xff] %vm711_vm0, %v710_v18 }
 0x1d7   : > { %v723_v19 = vpop.xlane.xlu1 %722 }
 0x1d8   : > { %725 = vst.msk [vmem:[%s396_s30 + $0x8] sm:$0xff] %vm711_vm0, %v723_v19 }
 0x1d9 PF: > { %s15_s19 = sadd.s32 1, %s1096_s19   ;;  %s1321_s15 = smov %s1084_s16 }
 0x1da   : > { %p12_p12 = scmp.ge.s32.totalorder %s15_s19, 4   ;;  %s1322_s16 = smov %s1163_s25 }
 0x1db   : > { %s1323_s17 = smov %s1092_s18  ;;  %s1324_s18 = smov %s1326_s20 }
 0x1dc   :  { %14 = sbr.rel (!%p12_p12) target bundleno = 3 (0x3), region = 171 }

// kernel: _lambda_.9
= control target key start
LH: loop header
LB: loop body
LE: loop exit
PB: predicated region body
PF: predicated region fallthrough
CT: control target
= control target key end

     0   :  { %s549_s12 = smov 0   ;;  %s551_s13 = smov 0   ;;  %s637_s0 = inlined_call_operand.vmem [shape: bf16[32,512], index: 0, kind: input, shape index: {}]   ;;  %s638_s1 = inlined_call_operand.vmem [shape: f32[32,1], index: 1, kind: input, shape index: {}]   ;;  %s639_s2 = inlined_call_operand.vmem [shape: f32[32,1], index: 2, kind: input, shape index: {}]   ;;  %s640_s3 = inlined_call_operand.vmem [shape: bf16[32,512], index: 3, kind: output, shape index: {}]  }
   0x1   :  { %s553_s14 = smov 0  }
   0x2 LB: > { %s452_s15 = sadd.s32 4294967295, %s526_s14   ;;  %s566_s16 = sadd.s32 1, %s526_s14   ;;  %s526_s14 = sphi %s553_s14, %s644_s14   ;;  %s522_s13 = sphi %s551_s13, %s643_s13   ;;  %s518_s12 = sphi %s549_s12, %s642_s12  }
   0x3   : > { %s17_s17 = ssub.s32 %s526_s14, %s566_s16  ;;  %s20_s18 = sadd.s32 1, %s522_s13 }
   0x4   : > { %p18_p0 = scmp.eq.s32.totalorder %s17_s17, 0  ;;  %p27_p1 = scmp.ne.s32.totalorder %s522_s13, %s518_s12 }
   0x5   : > { %p28_p2 = scmp.eq.s32.totalorder %s526_s14, 0  ;;  %p99_p3 = scmp.eq.s32.totalorder %s452_s15, 1 }
   0x6   : > { %s577_s19 = scalar_select %p18_p0, %s522_s13, %s20_s18  }
   0x7   : > { %p29_p4 = por %p28_p2, %p27_p1  ;;  %p579_p5 = por %p99_p3, %p27_p1 }
   0x8   : > { %p455_p6 = scmp.ge.s32.totalorder %s526_s14, 2 }
   0xa   : > { %127 = sbr.rel (%p455_p6) target bundleno = 24 (0x18), region = 24 }
  0x11   : > { %130 = sbr.rel (!%p29_p4) target bundleno = 24 (0x18), region = 28  ;;  %s132_s21 = sand.u32 (%p29_p4), 1, %s522_s13  }
  0x12   : > { %s471_s22 = sshll.u32 (%p29_p4), %s526_s14, 3  ;;  %s456_s23 = sshll.u32 (%p29_p4), %s132_s21, 5 }
  0x13   : > { %s137_s26 = scalar_lea.vmem (%p29_p4), %s637_s0, %s471_s22  ;;  %s134_s27 = scalar_lea.vmem (%p29_p4), [#allocation2], %s456_s23 }
  0x14   : > { %v171_v0 = vld [vmem:[%s137_s26] sm:$0xff] (%p29_p4)  ;;  %v173_v1 = vld [vmem:[%s137_s26 + $0x10] sm:$0xff] (%p29_p4) }
  0x15   : > { %v175_v2 = vld [vmem:[%s137_s26 + $0x20] sm:$0xff] (%p29_p4)  ;;  %172 = vst [vmem:[%s134_s27] sm:$0xff] (%p29_p4), %v171_v0  ;;  %174 = vst [vmem:[%s134_s27 + $0x8] sm:$0xff] (%p29_p4), %v173_v1  ;;  %v177_v3 = vld [vmem:[%s137_s26 + $0x30] sm:$0xff] (%p29_p4) }
  0x16   : > { %176 = vst [vmem:[%s134_s27 + $0x10] sm:$0xff] (%p29_p4), %v175_v2  ;;  %178 = vst [vmem:[%s134_s27 + $0x18] sm:$0xff] (%p29_p4), %v177_v3 }
  0x18 PF: > { %p459_p7 = scmp.ge.s32.totalorder %s526_s14, 1  ;;  %p183_p8 = scmp.lt.s32.totalorder %s526_s14, 3 }
  0x1a   : > { %p184_p9 = pnand %p459_p7, %p183_p8 }
  0x1b   : > { %v228_v4 = vld [vmem:[%s638_s1 + $0x10] sm:$0xff] (!%p184_p9)  ;;  %v226_v5 = vld [vmem:[%s638_s1] sm:$0xff] (!%p184_p9)  ;;  %v528_v6 = vmov (!%p184_p9), 0   ;;  %v229_v7 = vld [vmem:[%s638_s1 + $0x18] sm:$0xff] (!%p184_p9)  ;;  %s190_s24 = sand.u32 (!%p184_p9), 1, %s518_s12  }
  0x1c   : > { %187 = sbr.rel (%p184_p9) target bundleno = 188 (0xbc), region = 66  ;;  %503 = vset.pattern.permute.xlu1 (!%p184_p9), %v528_v6  ;;  %502 = vset.pattern.permute.xlu0 (!%p184_p9), %v528_v6  ;;  %v227_v8 = vld [vmem:[%s638_s1 + $0x8] sm:$0xff] (!%p184_p9)  ;;  %v258_v10 = vld [vmem:[%s639_s2] sm:$0xff] (!%p184_p9)  ;;  %v261_v11 = vld [vmem:[%s639_s2 + $0x18] sm:$0xff] (!%p184_p9)  ;;  %s616_s25 = sshll.u32 (!%p184_p9), %s190_s24, 5 }
  0x1d   : > { %242 = vperm.xlu1 (!%p184_p9), %503, %v228_v4   ;;  %232 = vperm.xlu0 (!%p184_p9), %502, %v226_v5   ;;  %v259_v9 = vld [vmem:[%s639_s2 + $0x8] sm:$0xff] (!%p184_p9)  ;;  %v260_v12 = vld [vmem:[%s639_s2 + $0x10] sm:$0xff] (!%p184_p9)  ;;  %s192_s26 = scalar_lea.vmem (!%p184_p9), [#allocation2], %s616_s25  ;;  %s211_s12 = scalar_lea.vmem (!%p184_p9), [#allocation3], %s616_s25 }
  0x1e   : > { %v214_v15 = vld [vmem:[%s192_s26] sm:$0xff] (!%p184_p9)  ;;  %v215_v16 = vld [vmem:[%s192_s26 + $0x8] sm:$0xff] (!%p184_p9)  ;;  %v216_v17 = vld [vmem:[%s192_s26 + $0x10] sm:$0xff] (!%p184_p9) }
  0x1f   : > { %v218_v18 = vunpack.c.l.bf16 (!%p184_p9), %v214_v15  ;;  %v219_v19 = vunpack.c.h.bf16 (!%p184_p9), %v214_v15  ;;  %v217_v20 = vld [vmem:[%s192_s26 + $0x18] sm:$0xff] (!%p184_p9)  ;;  %v220_v21 = vunpack.c.l.bf16 (!%p184_p9), %v215_v16  ;;  %v221_v22 = vunpack.c.h.bf16 (!%p184_p9), %v215_v16 }
  0x20   : > { %v222_v25 = vunpack.c.l.bf16 (!%p184_p9), %v216_v17  ;;  %v223_v26 = vunpack.c.h.bf16 (!%p184_p9), %v216_v17  ;;  %v224_v27 = vunpack.c.l.bf16 (!%p184_p9), %v217_v20  ;;  %v225_v28 = vunpack.c.h.bf16 (!%p184_p9), %v217_v20 }
  0x21   : > { %247 = vperm.xlu1 (!%p184_p9), %503, %v229_v7   ;;  %237 = vperm.xlu0 (!%p184_p9), %502, %v227_v8  }
  0x23   : > { %s476_s27 = sshll.u32 (%p579_p5), %s452_s15, 3 }
  0x24   : > { %s351_s30 = scalar_lea.vmem (%p579_p5), %s640_s3, %s476_s27 }
  0x25   : > { %269 = vperm.xlu1 %503, %v259_v9   ;;  %264 = vperm.xlu0 %502, %v258_v10  }
  0x29   : > { %279 = vperm.xlu1 %503, %v261_v11   ;;  %274 = vperm.xlu0 %502, %v260_v12  }
  0x9c   : > { %v243_v13 = vpop.permute.xlu1 %242  ;;  %v233_v14 = vpop.permute.xlu0 %232 }
  0x9d   : > { %v250_v29 = vmul.f32 %v233_v14, %v218_v18  ;;  %v251_v30 = vmul.f32 %v233_v14, %v219_v19  ;;  %v254_v39 = vmul.f32 %v243_v13, %v222_v25  ;;  %v255_v40 = vmul.f32 %v243_v13, %v223_v26 }
  0xa0   : > { %v248_v23 = vpop.permute.xlu1 %247  ;;  %v238_v24 = vpop.permute.xlu0 %237 }
  0xa1   : > { %v252_v31 = vmul.f32 %v238_v24, %v220_v21  ;;  %v253_v32 = vmul.f32 %v238_v24, %v221_v22  ;;  %v256_v41 = vmul.f32 %v248_v23, %v224_v27  ;;  %v257_v42 = vmul.f32 %v248_v23, %v225_v28 }
  0xa4   : > { %v270_v33 = vpop.permute.xlu1 %269  ;;  %v265_v34 = vpop.permute.xlu0 %264 }
  0xa5   : > { %v284_v35 = vadd.f32 %v270_v33, %v252_v31  ;;  %v285_v36 = vadd.f32 %v270_v33, %v253_v32  ;;  %v282_v37 = vadd.f32 %v265_v34, %v250_v29  ;;  %v283_v38 = vadd.f32 %v265_v34, %v251_v30 }
  0xa7   : > { %vm292_vm0 = vcmp.gt.f32.partialorder %v284_v35, 0.0  ;;  %vm293_vm1 = vcmp.gt.f32.partialorder %v285_v36, 0.0  ;;  %v300_v43 = vmul.f32 0.01, %v284_v35  ;;  %v301_v44 = vmul.f32 0.01, %v285_v36 }
  0xa8   : > { %vm290_vm2 = vcmp.gt.f32.partialorder %v282_v37, 0.0  ;;  %vm291_vm3 = vcmp.gt.f32.partialorder %v283_v38, 0.0  ;;  %v298_v45 = vmul.f32 0.01, %v282_v37  ;;  %v299_v46 = vmul.f32 0.01, %v283_v38  ;;  %v280_v47 = vpop.permute.xlu1 %279  ;;  %v275_v48 = vpop.permute.xlu0 %274 }
  0xa9   : > { %v308_v49 = vsel %vm292_vm0, %v284_v35, %v300_v43  ;;  %v309_v50 = vsel %vm293_vm1, %v285_v36, %v301_v44  ;;  %v288_v51 = vadd.f32 %v280_v47, %v256_v41  ;;  %v289_v52 = vadd.f32 %v280_v47, %v257_v42 }
  0xaa   : > { %v473_v53 = vpack.c.bf16 %v309_v50, %v308_v49  ;;  %v306_v54 = vsel %vm290_vm2, %v282_v37, %v298_v45  ;;  %v307_v55 = vsel %vm291_vm3, %v283_v38, %v299_v46  ;;  %v286_v56 = vadd.f32 %v275_v48, %v254_v39 }
  0xab   : > { %v472_v57 = vpack.c.bf16 %v307_v55, %v306_v54  ;;  %vm296_vm4 = vcmp.gt.f32.partialorder %v288_v51, 0.0  ;;  %vm297_vm5 = vcmp.gt.f32.partialorder %v289_v52, 0.0  ;;  %v304_v58 = vmul.f32 0.01, %v288_v51 }
  0xac   : > { %339 = vst [vmem:[%s211_s12 + $0x8] sm:$0xff] %v473_v53  ;;  %v305_v59 = vmul.f32 0.01, %v289_v52  ;;  %v287_v60 = vadd.f32 %v275_v48, %v255_v40  ;;  %vm294_vm6 = vcmp.gt.f32.partialorder %v286_v56, 0.0  ;;  %v302_v61 = vmul.f32 0.01, %v286_v56 }
  0xad   : > { %338 = vst [vmem:[%s211_s12] sm:$0xff] %v472_v57  ;;  %v312_v62 = vsel %vm296_vm4, %v288_v51, %v304_v58  ;;  %348 = sbr.rel (!%p579_p5) target bundleno = 188 (0xbc), region = 74 }
  0xae   : > { %v313_v63 = vsel %vm297_vm5, %v289_v52, %v305_v59  ;;  %vm295_vm7 = vcmp.gt.f32.partialorder %v287_v60, 0.0  ;;  %v303_v0 = vmul.f32 0.01, %v287_v60  ;;  %v310_v1 = vsel %vm294_vm6, %v286_v56, %v302_v61 }
  0xaf   : > { %v475_v2 = vpack.c.bf16 %v313_v63, %v312_v62 }
  0xb0   : > { %v311_v3 = vsel %vm295_vm7, %v287_v60, %v303_v0 }
  0xb1   : > { %341 = vst [vmem:[%s211_s12 + $0x18] sm:$0xff] %v475_v2  ;;  %v474_v4 = vpack.c.bf16 %v311_v3, %v310_v1 }
  0xb3   : > { %340 = vst [vmem:[%s211_s12 + $0x10] sm:$0xff] %v474_v4  ;;  %v387_v6 = vld [vmem:[%s211_s12 + $0x8] sm:$0xff] (%p579_p5) }
  0xb4   : > { %v385_v5 = vld [vmem:[%s211_s12] sm:$0xff]  ;;  %388 = vst [vmem:[%s351_s30 + $0x10] sm:$0xff] %v387_v6 }
  0xb5   : > { %386 = vst [vmem:[%s351_s30] sm:$0xff] %v385_v5 }
  0xb8   : > { %v391_v8 = vld [vmem:[%s211_s12 + $0x18] sm:$0xff] }
  0xb9   : > { %392 = vst [vmem:[%s351_s30 + $0x30] sm:$0xff] %v391_v8 }
  0xba   : > { %v389_v7 = vld [vmem:[%s211_s12 + $0x10] sm:$0xff] }
  0xbb   : > { %390 = vst [vmem:[%s351_s30 + $0x20] sm:$0xff] %v389_v7 }
  0xbc PF: > { %p10_p10 = scmp.ge.s32.totalorder %s566_s16, 4   ;;  %s642_s12 = smov %s522_s13 }
  0xbd   : > { %s643_s13 = smov %s577_s19  ;;  %s644_s14 = smov %s566_s16 }
  0xbe   :  { %12 = sbr.rel (!%p10_p10) target bundleno = 2 (0x2), region = 143 }

// kernel: _lambda_.8
= control target key start
LH: loop header
LB: loop body
LE: loop exit
PB: predicated region body
PF: predicated region fallthrough
CT: control target
= control target key end

     0   :  { %s1268_s15 = smov 0   ;;  %s1270_s16 = smov 0   ;;  %s1484_s0 = inlined_call_operand.vmem [shape: bf16[32,256], index: 0, kind: input, shape index: {}]   ;;  %s1485_s1 = inlined_call_operand.vmem [shape: bf16[256,512], index: 1, kind: input, shape index: {}]   ;;  %s1486_s2 = inlined_call_operand.vmem [shape: bf16[32,512], index: 2, kind: output, shape index: {0}]   ;;  %s1487_s3 = inlined_call_operand.vmem [shape: f32[2,32,1], index: 3, kind: output, shape index: {1}]   ;;  %s1488_s4 = inlined_call_operand.vmem [shape: f32[2,32,1], index: 4, kind: output, shape index: {2}]  }
   0x1   :  { %s1272_s17 = smov 0   ;;  %s1274_s18 = smov 0  }
   0x2   :  { %s1276_s19 = smov 0  }
   0x3 LB: > { %s27_s20 = sadd.s32 1, %s1237_s18  ;;  %s1010_s21 = sadd.s32 4294967295, %s1241_s19   ;;  %s1241_s19 = sphi %s1276_s19, %s15_s19   ;;  %s1237_s18 = sphi %s1274_s18, %s1493_s18   ;;  %s1233_s17 = sphi %s1272_s17, %s1492_s17   ;;  %s1229_s16 = sphi %s1270_s16, %s1491_s16   ;;  %s1225_s15 = sphi %s1268_s15, %s1490_s15  }
   0x4   : > { %p29_p0 = scmp.ge.s32.totalorder %s27_s20, 2  ;;  %p64_p1 = scmp.ne.s32.totalorder %s1229_s16, %s1225_s15 }
   0x5   : > { %p65_p2 = scmp.eq.s32.totalorder %s1241_s19, 0  ;;  %p96_p4 = scmp.eq.s32.totalorder %s1010_s21, 1 }
   0x6   : > { %s1495_s20 = smov (%p29_p0, %s27_s20), 0  ;;  %s57_s23 = sadd.s32 1, %s1229_s16 }
   0x7   : > { %p66_p3 = por %p65_p2, %p64_p1  ;;  %s54_s22 = ssub.s32 %s1237_s18, %s1495_s20 }
   0x8   : > { %p55_p5 = scmp.eq.s32.totalorder %s54_s22, 0  ;;  %p1303_p6 = por %p96_p4, %p64_p1 }
   0x9   : > { %p1013_p7 = scmp.ge.s32.totalorder %s1241_s19, 2 }
   0xa   : > { %s1308_s25 = scalar_select %p55_p5, %s1229_s16, %s57_s23  }
   0xb   : > { %173 = sbr.rel (%p1013_p7) target bundleno = 38 (0x26), region = 20 }
  0x12   : > { %176 = sbr.rel (!%p66_p3) target bundleno = 38 (0x26), region = 24  ;;  %s178_s26 = sand.u32 (%p66_p3), 1, %s1229_s16  }
  0x13   : > { %s1069_s27 = sshll.u32 (%p66_p3), %s1237_s18, 3  ;;  %s1014_s28 = sshll.u32 (%p66_p3), %s178_s26, 8 }
  0x14   : > { %s1316_s5 = scalar_lea.vmem (%p66_p3), %s1485_s1, %s1069_s27  ;;  %s1321_s6 = scalar_lea.vmem (%p66_p3), [#allocation4], %s1014_s28 }
  0x15   : > { %v274_v0 = vld [vmem:[%s1316_s5] sm:$0xff] (%p66_p3)  ;;  %v276_v1 = vld [vmem:[%s1316_s5 + $0x10] sm:$0xff] (%p66_p3) }
  0x16   : > { %v278_v2 = vld [vmem:[%s1316_s5 + $0x20] sm:$0xff] (%p66_p3)  ;;  %275 = vst [vmem:[%s1321_s6] sm:$0xff] (%p66_p3), %v274_v0  ;;  %277 = vst [vmem:[%s1321_s6 + $0x8] sm:$0xff] (%p66_p3), %v276_v1  ;;  %v280_v3 = vld [vmem:[%s1316_s5 + $0x30] sm:$0xff] (%p66_p3) }
  0x17   : > { %279 = vst [vmem:[%s1321_s6 + $0x10] sm:$0xff] (%p66_p3), %v278_v2  ;;  %v282_v4 = vld [vmem:[%s1316_s5 + $0x40] sm:$0xff] (%p66_p3)  ;;  %v284_v5 = vld [vmem:[%s1316_s5 + $0x50] sm:$0xff] (%p66_p3)  ;;  %281 = vst [vmem:[%s1321_s6 + $0x18] sm:$0xff] (%p66_p3), %v280_v3 }
  0x18   : > { %283 = vst [vmem:[%s1321_s6 + $0x20] sm:$0xff] (%p66_p3), %v282_v4  ;;  %285 = vst [vmem:[%s1321_s6 + $0x28] sm:$0xff] (%p66_p3), %v284_v5  ;;  %v286_v6 = vld [vmem:[%s1316_s5 + $0x60] sm:$0xff] (%p66_p3)  ;;  %v288_v7 = vld [vmem:[%s1316_s5 + $0x70] sm:$0xff] (%p66_p3) }
  0x19   : > { %v290_v8 = vld [vmem:[%s1316_s5 + $0x80] sm:$0xff]  ;;  %287 = vst [vmem:[%s1321_s6 + $0x30] sm:$0xff] %v286_v6  ;;  %289 = vst [vmem:[%s1321_s6 + $0x38] sm:$0xff] %v288_v7  ;;  %v292_v9 = vld [vmem:[%s1316_s5 + $0x90] sm:$0xff] }
  0x1a   : > { %291 = vst [vmem:[%s1321_s6 + $0x40] sm:$0xff] %v290_v8  ;;  %v294_v10 = vld [vmem:[%s1316_s5 + $0xa0] sm:$0xff]  ;;  %v296_v11 = vld [vmem:[%s1316_s5 + $0xb0] sm:$0xff]  ;;  %293 = vst [vmem:[%s1321_s6 + $0x48] sm:$0xff] %v292_v9 }
  0x1b   : > { %295 = vst [vmem:[%s1321_s6 + $0x50] sm:$0xff] %v294_v10  ;;  %297 = vst [vmem:[%s1321_s6 + $0x58] sm:$0xff] %v296_v11  ;;  %v298_v12 = vld [vmem:[%s1316_s5 + $0xc0] sm:$0xff]  ;;  %v300_v13 = vld [vmem:[%s1316_s5 + $0xd0] sm:$0xff] }
  0x1c   : > { %v302_v14 = vld [vmem:[%s1316_s5 + $0xe0] sm:$0xff]  ;;  %299 = vst [vmem:[%s1321_s6 + $0x60] sm:$0xff] %v298_v12  ;;  %301 = vst [vmem:[%s1321_s6 + $0x68] sm:$0xff] %v300_v13  ;;  %v304_v15 = vld [vmem:[%s1316_s5 + $0xf0] sm:$0xff] }
  0x1d   : > { %303 = vst [vmem:[%s1321_s6 + $0x70] sm:$0xff] %v302_v14  ;;  %v306_v16 = vld [vmem:[%s1316_s5 + $0x100] sm:$0xff]  ;;  %v308_v17 = vld [vmem:[%s1316_s5 + $0x110] sm:$0xff]  ;;  %305 = vst [vmem:[%s1321_s6 + $0x78] sm:$0xff] %v304_v15 }
  0x1e   : > { %307 = vst [vmem:[%s1321_s6 + $0x80] sm:$0xff] %v306_v16  ;;  %309 = vst [vmem:[%s1321_s6 + $0x88] sm:$0xff] %v308_v17  ;;  %v310_v18 = vld [vmem:[%s1316_s5 + $0x120] sm:$0xff]  ;;  %v312_v19 = vld [vmem:[%s1316_s5 + $0x130] sm:$0xff] }
  0x1f   : > { %v314_v20 = vld [vmem:[%s1316_s5 + $0x140] sm:$0xff]  ;;  %311 = vst [vmem:[%s1321_s6 + $0x90] sm:$0xff] %v310_v18  ;;  %313 = vst [vmem:[%s1321_s6 + $0x98] sm:$0xff] %v312_v19  ;;  %v316_v21 = vld [vmem:[%s1316_s5 + $0x150] sm:$0xff] }
  0x20   : > { %315 = vst [vmem:[%s1321_s6 + $0xa0] sm:$0xff] %v314_v20  ;;  %v318_v22 = vld [vmem:[%s1316_s5 + $0x160] sm:$0xff]  ;;  %v320_v23 = vld [vmem:[%s1316_s5 + $0x170] sm:$0xff]  ;;  %317 = vst [vmem:[%s1321_s6 + $0xa8] sm:$0xff] %v316_v21 }
  0x21   : > { %319 = vst [vmem:[%s1321_s6 + $0xb0] sm:$0xff] %v318_v22  ;;  %321 = vst [vmem:[%s1321_s6 + $0xb8] sm:$0xff] %v320_v23  ;;  %v322_v24 = vld [vmem:[%s1316_s5 + $0x180] sm:$0xff]  ;;  %v324_v25 = vld [vmem:[%s1316_s5 + $0x190] sm:$0xff] }
  0x22   : > { %v326_v26 = vld [vmem:[%s1316_s5 + $0x1a0] sm:$0xff]  ;;  %323 = vst [vmem:[%s1321_s6 + $0xc0] sm:$0xff] %v322_v24  ;;  %325 = vst [vmem:[%s1321_s6 + $0xc8] sm:$0xff] %v324_v25  ;;  %v328_v27 = vld [vmem:[%s1316_s5 + $0x1b0] sm:$0xff] }
  0x23   : > { %327 = vst [vmem:[%s1321_s6 + $0xd0] sm:$0xff] %v326_v26  ;;  %v330_v28 = vld [vmem:[%s1316_s5 + $0x1c0] sm:$0xff]  ;;  %v332_v29 = vld [vmem:[%s1316_s5 + $0x1d0] sm:$0xff]  ;;  %329 = vst [vmem:[%s1321_s6 + $0xd8] sm:$0xff] %v328_v27 }
  0x24   : > { %331 = vst [vmem:[%s1321_s6 + $0xe0] sm:$0xff] %v330_v28  ;;  %333 = vst [vmem:[%s1321_s6 + $0xe8] sm:$0xff] %v332_v29  ;;  %v334_v30 = vld [vmem:[%s1316_s5 + $0x1e0] sm:$0xff]  ;;  %v336_v31 = vld [vmem:[%s1316_s5 + $0x1f0] sm:$0xff] }
  0x25   : > { %335 = vst [vmem:[%s1321_s6 + $0xf0] sm:$0xff] %v334_v30  ;;  %337 = vst [vmem:[%s1321_s6 + $0xf8] sm:$0xff] %v336_v31 }
  0x26 PF: > { %p1017_p8 = scmp.ge.s32.totalorder %s1241_s19, 1  ;;  %p342_p9 = scmp.lt.s32.totalorder %s1241_s19, 3 }
  0x28   : > { %p343_p10 = pnand %p1017_p8, %p342_p9 }
  0x29   : > { %s349_s7 = sand.u32 (!%p343_p10), 1, %s1225_s15   ;;  %v1199_v32 = vld [vmem:[%s1484_s0 + $0x4] ss:$8 sps:$4 sm:$0xff] (!%p343_p10)   ;;  %v1202_v33 = vld [vmem:[%s1484_s0 + $0x14] ss:$8 sps:$4 sm:$0xff] (!%p343_p10)   ;;  %p387_p11 = scmp.lt.s32.totalorder (!%p343_p10), %s1233_s17, 1 }
  0x2a   : > { %346 = sbr.rel (%p343_p10) target bundleno = 480 (0x1e0), region = 62  ;;  %s1018_s8 = sshll.u32 (!%p343_p10), %s349_s7, 8  ;;  %665 = vmatprep.mubr.bf16.mxu0 (!%p343_p10), %v1199_v32  ;;  %675 = vmatprep.mubr.bf16.mxu1 (!%p343_p10), %v1202_v33  ;;  %v1197_v2 = vld [vmem:[%s1484_s0] ss:$8 sps:$4 sm:$0xff] (!%p343_p10)   ;;  %v1200_v3 = vld [vmem:[%s1484_s0 + $0x10] ss:$8 sps:$4 sm:$0xff] (!%p343_p10)  }
  0x2b   : > { %s1395_s13 = scalar_lea.vmem (!%p343_p10), [#allocation4], %s1018_s8  ;;  %s1019_s26 = sshll.u32 (!%p343_p10), %s349_s7, 5  ;;  %vm793_vm0 = vcmask (!%p343_p10), 7168  }
  0x2c   : > { %v1149_v34 = vld [vmem:[%s1395_s13 + $0x4] ss:$8 sps:$4 sm:$0xff] (!%p343_p10)   ;;  %v1151_v35 = vld [vmem:[%s1395_s13] ss:$8 sps:$4 sm:$0xff] (!%p343_p10)   ;;  %v1152_v36 = vld [vmem:[%s1395_s13 + $0x14] ss:$8 sps:$4 sm:$0xff] (!%p343_p10)  }
  0x2d   : > { %633 = vmatprep.subr.bf16.mxu0 (!%p343_p10), %v1149_v34  ;;  %1077 = vmatprep.subr.bf16.mxu1 (!%p343_p10), %v1149_v34  ;;  %v1154_v37 = vld [vmem:[%s1395_s13 + $0x10] ss:$8 sps:$4 sm:$0xff] (!%p343_p10)   ;;  %v1155_v38 = vld [vmem:[%s1395_s13 + $0x24] ss:$8 sps:$4 sm:$0xff] (!%p343_p10)   ;;  %v1157_v39 = vld [vmem:[%s1395_s13 + $0x20] ss:$8 sps:$4 sm:$0xff] (!%p343_p10)  }
  0x2e   : > { %634 = vmatpush1.bf16.msra.mxu0 (!%p343_p10), %v1151_v35  ;;  %1093 = vmatpush1.bf16.msra.mxu1 (!%p343_p10), %v1151_v35  ;;  %v1158_v40 = vld [vmem:[%s1395_s13 + $0x34] ss:$8 sps:$4 sm:$0xff] (!%p343_p10)   ;;  %v1160_v41 = vld [vmem:[%s1395_s13 + $0x30] ss:$8 sps:$4 sm:$0xff] (!%p343_p10)   ;;  %v1161_v42 = vld [vmem:[%s1395_s13 + $0x44] ss:$8 sps:$4 sm:$0xff] (!%p343_p10)  }
  0x2f   : > { %635 = vmatprep.subr.bf16.mxu0 (!%p343_p10), %v1152_v36  ;;  %1078 = vmatprep.subr.bf16.mxu1 (!%p343_p10), %v1152_v36  ;;  %v1163_v43 = vld [vmem:[%s1395_s13 + $0x40] ss:$8 sps:$4 sm:$0xff] (!%p343_p10)   ;;  %v1164_v44 = vld [vmem:[%s1395_s13 + $0x54] ss:$8 sps:$4 sm:$0xff] (!%p343_p10)   ;;  %v1166_v45 = vld [vmem:[%s1395_s13 + $0x50] ss:$8 sps:$4 sm:$0xff] (!%p343_p10)  }
  0x30   : > { %v1167_v46 = vld [vmem:[%s1395_s13 + $0x64] ss:$8 sps:$4 sm:$0xff] (!%p343_p10)   ;;  %v1169_v47 = vld [vmem:[%s1395_s13 + $0x60] ss:$8 sps:$4 sm:$0xff] (!%p343_p10)   ;;  %v1170_v48 = vld [vmem:[%s1395_s13 + $0x74] ss:$8 sps:$4 sm:$0xff] (!%p343_p10)  }
  0x31   : > { %v1172_v49 = vld [vmem:[%s1395_s13 + $0x70] ss:$8 sps:$4 sm:$0xff]   ;;  %v1173_v50 = vld [vmem:[%s1395_s13 + $0x84] ss:$8 sps:$4 sm:$0xff]   ;;  %v1175_v51 = vld [vmem:[%s1395_s13 + $0x80] ss:$8 sps:$4 sm:$0xff]  }
  0x32   : > { %636 = vmatpush1.bf16.msra.mxu0 %v1154_v37  ;;  %1094 = vmatpush1.bf16.msra.mxu1 %v1154_v37  ;;  %v1176_v52 = vld [vmem:[%s1395_s13 + $0x94] ss:$8 sps:$4 sm:$0xff]   ;;  %v1178_v53 = vld [vmem:[%s1395_s13 + $0x90] ss:$8 sps:$4 sm:$0xff]   ;;  %v1179_v54 = vld [vmem:[%s1395_s13 + $0xa4] ss:$8 sps:$4 sm:$0xff]  }
  0x33   : > { %637 = vmatprep.subr.bf16.mxu0 %v1155_v38  ;;  %1079 = vmatprep.subr.bf16.mxu1 %v1155_v38  ;;  %v1181_v55 = vld [vmem:[%s1395_s13 + $0xa0] ss:$8 sps:$4 sm:$0xff]   ;;  %v1182_v56 = vld [vmem:[%s1395_s13 + $0xb4] ss:$8 sps:$4 sm:$0xff]   ;;  %v1184_v57 = vld [vmem:[%s1395_s13 + $0xb0] ss:$8 sps:$4 sm:$0xff]  }
  0x34   : > { %v1185_v58 = vld [vmem:[%s1395_s13 + $0xc4] ss:$8 sps:$4 sm:$0xff]   ;;  %v1187_v59 = vld [vmem:[%s1395_s13 + $0xc0] ss:$8 sps:$4 sm:$0xff]   ;;  %v1188_v60 = vld [vmem:[%s1395_s13 + $0xd4] ss:$8 sps:$4 sm:$0xff]  }
  0x35   : > { %v1190_v61 = vld [vmem:[%s1395_s13 + $0xd0] ss:$8 sps:$4 sm:$0xff]   ;;  %v1191_v62 = vld [vmem:[%s1395_s13 + $0xe4] ss:$8 sps:$4 sm:$0xff]   ;;  %v1193_v63 = vld [vmem:[%s1395_s13 + $0xe0] ss:$8 sps:$4 sm:$0xff]  }
  0x36   : > { %638 = vmatpush1.bf16.msra.mxu0 %v1157_v39  ;;  %1095 = vmatpush1.bf16.msra.mxu1 %v1157_v39  ;;  %v1194_v0 = vld [vmem:[%s1395_s13 + $0xf4] ss:$8 sps:$4 sm:$0xff]   ;;  %v1196_v1 = vld [vmem:[%s1395_s13 + $0xf0] ss:$8 sps:$4 sm:$0xff]   ;;  %s1437_s15 = scalar_lea.vmem [#allocation5], %s1019_s26  ;;  %s1076_s9 = sshll.u32 (%p1303_p6), %s1233_s17, 3 }
  0x37   : > { %639 = vmatprep.subr.bf16.mxu0 %v1158_v40  ;;  %1080 = vmatprep.subr.bf16.mxu1 %v1158_v40  ;;  %s388_s27 = scalar_select %p387_p11, %s1233_s17, 1 }
  0x38   : > { %s842_s12 = scalar_lea.vmem (%p1303_p6), %s1486_s2, %s1076_s9 }
  0x39   : > { %s1070_s28 = sshll.u32 %s388_s27, 5 }
  0x3a   : > { %640 = vmatpush1.bf16.msra.mxu0 %v1160_v41  ;;  %1096 = vmatpush1.bf16.msra.mxu1 %v1160_v41  ;;  %s391_s5 = scalar_lea.vmem %s1487_s3, %s1070_s28  ;;  %s396_s8 = scalar_lea.vmem %s1488_s4, %s1070_s28 }
  0x3b   : > { %641 = vmatprep.subr.bf16.mxu0 %v1161_v42  ;;  %1081 = vmatprep.subr.bf16.mxu1 %v1161_v42 }
  0x3e   : > { %642 = vmatpush1.bf16.msra.mxu0 %v1163_v43  ;;  %1097 = vmatpush1.bf16.msra.mxu1 %v1163_v43 }
  0x3f   : > { %643 = vmatprep.subr.bf16.mxu0 %v1164_v44  ;;  %1082 = vmatprep.subr.bf16.mxu1 %v1164_v44 }
  0x42   : > { %644 = vmatpush1.bf16.msra.mxu0 %v1166_v45  ;;  %1098 = vmatpush1.bf16.msra.mxu1 %v1166_v45 }
  0x43   : > { %645 = vmatprep.subr.bf16.mxu0 %v1167_v46  ;;  %1083 = vmatprep.subr.bf16.mxu1 %v1167_v46 }
  0x46   : > { %646 = vmatpush1.bf16.msra.mxu0 %v1169_v47  ;;  %1099 = vmatpush1.bf16.msra.mxu1 %v1169_v47 }
  0x47   : > { %647 = vmatprep.subr.bf16.mxu0 %v1170_v48  ;;  %1084 = vmatprep.subr.bf16.mxu1 %v1170_v48 }
  0x4a   : > { %648 = vmatpush1.bf16.msra.mxu0 %v1172_v49  ;;  %1100 = vmatpush1.bf16.msra.mxu1 %v1172_v49 }
  0x4b   : > { %649 = vmatprep.subr.bf16.mxu0 %v1173_v50  ;;  %1085 = vmatprep.subr.bf16.mxu1 %v1173_v50 }
  0x4e   : > { %650 = vmatpush1.bf16.msra.mxu0 %v1175_v51  ;;  %1101 = vmatpush1.bf16.msra.mxu1 %v1175_v51 }
  0x4f   : > { %651 = vmatprep.subr.bf16.mxu0 %v1176_v52  ;;  %1086 = vmatprep.subr.bf16.mxu1 %v1176_v52 }
  0x52   : > { %652 = vmatpush1.bf16.msra.mxu0 %v1178_v53  ;;  %1102 = vmatpush1.bf16.msra.mxu1 %v1178_v53 }
  0x53   : > { %653 = vmatprep.subr.bf16.mxu0 %v1179_v54  ;;  %1087 = vmatprep.subr.bf16.mxu1 %v1179_v54 }
  0x56   : > { %654 = vmatpush1.bf16.msra.mxu0 %v1181_v55  ;;  %1103 = vmatpush1.bf16.msra.mxu1 %v1181_v55 }
  0x57   : > { %655 = vmatprep.subr.bf16.mxu0 %v1182_v56  ;;  %1088 = vmatprep.subr.bf16.mxu1 %v1182_v56 }
  0x5a   : > { %656 = vmatpush1.bf16.msra.mxu0 %v1184_v57  ;;  %1104 = vmatpush1.bf16.msra.mxu1 %v1184_v57 }
  0x5b   : > { %657 = vmatprep.subr.bf16.mxu0 %v1185_v58  ;;  %1089 = vmatprep.subr.bf16.mxu1 %v1185_v58 }
  0x5e   : > { %658 = vmatpush1.bf16.msra.mxu0 %v1187_v59  ;;  %1105 = vmatpush1.bf16.msra.mxu1 %v1187_v59 }
  0x5f   : > { %659 = vmatprep.subr.bf16.mxu0 %v1188_v60  ;;  %1090 = vmatprep.subr.bf16.mxu1 %v1188_v60 }
  0x62   : > { %660 = vmatpush1.bf16.msra.mxu0 %v1190_v61  ;;  %1106 = vmatpush1.bf16.msra.mxu1 %v1190_v61 }
  0x63   : > { %661 = vmatprep.subr.bf16.mxu0 %v1191_v62  ;;  %1091 = vmatprep.subr.bf16.mxu1 %v1191_v62 }
  0x66   : > { %662 = vmatpush1.bf16.msra.mxu0 %v1193_v63  ;;  %1107 = vmatpush1.bf16.msra.mxu1 %v1193_v63 }
  0x67   : > { %663 = vmatprep.subr.bf16.mxu0 %v1194_v0  ;;  %1092 = vmatprep.subr.bf16.mxu1 %v1194_v0 }
  0x6a   : > { %664 = vmatpush1.bf16.msra.mxu0 %v1196_v1  ;;  %1108 = vmatpush1.bf16.msra.mxu1 %v1196_v1 }
  0x6d   : > { %666 = vmatmul.mubr.bf16.vlgmr.msra.gmra.mrb[0].mxu0 %v1197_v2  ;;  %676 = vmatmul.mubr.bf16.vlgmr.msra.gmra.mrb[0].mxu1 %v1200_v3 }
 0x140   : > { %v667_v4 = vpop.f32.mrb[0].mxu0  ;;  %v677_v5 = vpop.f32.mrb[0].mxu1 }
 0x141   : > { %v669_v6 = vpop.f32.mrb[1].mxu0  ;;  %v679_v7 = vpop.f32.mrb[1].mxu1  ;;  %v746_v8 = vmul.f32 %v667_v4, %v667_v4  ;;  %v750_v9 = vmul.f32 %v677_v5, %v677_v5 }
 0x142   : > { %v1072_v10 = vpack.c.bf16 %v669_v6, %v667_v4  ;;  %v1074_v11 = vpack.c.bf16 %v679_v7, %v677_v5  ;;  %v671_v12 = vpop.f32.mrb[2].mxu0  ;;  %v681_v13 = vpop.f32.mrb[2].mxu1  ;;  %v787_v14 = vadd.f32 %v679_v7, %v677_v5  ;;  %v781_v15 = vadd.f32 %v669_v6, %v667_v4 }
 0x143   : > { %v673_v16 = vpop.f32.mrb[3].mxu0  ;;  %v683_v17 = vpop.f32.mrb[3].mxu1  ;;  %v747_v18 = vmul.f32 %v669_v6, %v669_v6  ;;  %v748_v19 = vmul.f32 %v671_v12, %v671_v12  ;;  %v751_v20 = vmul.f32 %v679_v7, %v679_v7  ;;  %v752_v21 = vmul.f32 %v681_v13, %v681_v13 }
 0x144   : > { %710 = vst [vmem:[%s1437_s15] sm:$0xff] %v1072_v10  ;;  %712 = vst [vmem:[%s1437_s15 + $0x10] sm:$0xff] %v1074_v11  ;;  %v1073_v22 = vpack.c.bf16 %v673_v16, %v671_v12  ;;  %v749_v23 = vmul.f32 %v673_v16, %v673_v16  ;;  %v1075_v24 = vpack.c.bf16 %v683_v17, %v681_v13  ;;  %788 = vadd.xlane.f32.xlu1 %v787_v14 }
 0x145   : > { %v753_v25 = vmul.f32 %v683_v17, %v683_v17  ;;  %782 = vadd.xlane.f32.xlu0 %v781_v15  ;;  %v790_v26 = vadd.f32 %v683_v17, %v681_v13  ;;  %v784_v27 = vadd.f32 %v673_v16, %v671_v12  ;;  %v806_v28 = vadd.f32 %v747_v18, %v746_v8 }
 0x146   : > { %v812_v29 = vadd.f32 %v751_v20, %v750_v9  ;;  %711 = vst [vmem:[%s1437_s15 + $0x8] sm:$0xff] %v1073_v22  ;;  %713 = vst [vmem:[%s1437_s15 + $0x18] sm:$0xff] %v1075_v24  ;;  %v809_v30 = vadd.f32 %v749_v23, %v748_v19 }
 0x147   : > { %v815_v31 = vadd.f32 %v753_v25, %v752_v21 }
 0x148   : > { %791 = vadd.xlane.f32.xlu1 %v790_v26 }
 0x149   : > { %785 = vadd.xlane.f32.xlu0 %v784_v27 }
 0x14b   : > { %v876_v40 = vld [vmem:[%s1437_s15] sm:$0xff] (%p1303_p6)  ;;  %v880_v42 = vld [vmem:[%s1437_s15 + $0x10] sm:$0xff] (%p1303_p6) }
 0x14c   : > { %810 = vadd.xlane.f32.xlu1 %v809_v30  ;;  %877 = vst [vmem:[%s842_s12] sm:$0xff] (%p1303_p6), %v876_v40  ;;  %881 = vst [vmem:[%s842_s12 + $0x20] sm:$0xff] (%p1303_p6), %v880_v42 }
 0x14d   : > { %807 = vadd.xlane.f32.xlu0 %v806_v28  ;;  %v878_v41 = vld [vmem:[%s1437_s15 + $0x8] sm:$0xff] (%p1303_p6)  ;;  %v882_v43 = vld [vmem:[%s1437_s15 + $0x18] sm:$0xff] (%p1303_p6) }
 0x14e   : > { %879 = vst [vmem:[%s842_s12 + $0x10] sm:$0xff] (%p1303_p6), %v878_v41  ;;  %883 = vst [vmem:[%s842_s12 + $0x30] sm:$0xff] (%p1303_p6), %v882_v43 }
 0x150   : > { %816 = vadd.xlane.f32.xlu1 %v815_v31 }
 0x151   : > { %813 = vadd.xlane.f32.xlu0 %v812_v29 }
 0x1d1   : > { %v789_v32 = vpop.xlane.xlu1 %788 }
 0x1d2   : > { %796 = vst.msk [vmem:[%s391_s5 + $0x10] sm:$0xff] %vm793_vm0, %v789_v32  ;;  %v783_v33 = vpop.xlane.xlu0 %782 }
 0x1d3   : > { %794 = vst.msk [vmem:[%s391_s5] sm:$0xff] %vm793_vm0, %v783_v33 }
 0x1d5   : > { %v792_v34 = vpop.xlane.xlu1 %791 }
 0x1d6   : > { %797 = vst.msk [vmem:[%s391_s5 + $0x18] sm:$0xff] %vm793_vm0, %v792_v34  ;;  %v786_v35 = vpop.xlane.xlu0 %785 }
 0x1d7   : > { %795 = vst.msk [vmem:[%s391_s5 + $0x8] sm:$0xff] %vm793_vm0, %v786_v35 }
 0x1d9   : > { %v811_v36 = vpop.xlane.xlu1 %810  ;;  %838 = sbr.rel (!%p1303_p6) target bundleno = 480 (0x1e0), region = 78 }
 0x1da   : > { %v808_v37 = vpop.xlane.xlu0 %807  ;;  %819 = vst.msk [vmem:[%s396_s8 + $0x8] sm:$0xff] %vm793_vm0, %v811_v36 }
 0x1db   : > { %818 = vst.msk [vmem:[%s396_s8] sm:$0xff] %vm793_vm0, %v808_v37 }
 0x1dd   : > { %v817_v38 = vpop.xlane.xlu1 %816 }
 0x1de   : > { %v814_v39 = vpop.xlane.xlu0 %813  ;;  %821 = vst.msk [vmem:[%s396_s8 + $0x18] sm:$0xff] %vm793_vm0, %v817_v38 }
 0x1df   : > { %820 = vst.msk [vmem:[%s396_s8 + $0x10] sm:$0xff] %vm793_vm0, %v814_v39 }
 0x1e0 PF: > { %s15_s19 = sadd.s32 1, %s1241_s19   ;;  %s1490_s15 = smov %s1229_s16 }
 0x1e1   : > { %p12_p12 = scmp.ge.s32.totalorder %s15_s19, 4   ;;  %s1491_s16 = smov %s1308_s25 }
 0x1e2   : > { %s1492_s17 = smov %s1237_s18  ;;  %s1493_s18 = smov %s1495_s20 }
 0x1e3   :  { %14 = sbr.rel (!%p12_p12) target bundleno = 3 (0x3), region = 171 }

// kernel: reverse
= control target key start
LH: loop header
LB: loop body
LE: loop exit
PB: predicated region body
PF: predicated region fallthrough
CT: control target
= control target key end

     0   :  { %s1593_s0 = inlined_call_operand.vmem [shape: bf16[288,32,3,3], index: 0, kind: input, shape index: {}]   ;;  %s1594_s1 = inlined_call_operand.vmem [shape: bf16[288,32,3,3], index: 1, kind: output, shape index: {}]  }
   0x1   :  { %v1115_v0 = vld [vmem:[%s1593_s0 + $0x180] sm:$0xff]   ;;  %v1116_v1 = vld [vmem:[%s1593_s0 + $0xf0] sm:$0xff]   ;;  %v1133_v18 = vld [vmem:[%s1593_s0 + $0x198] sm:$0xff]  }
   0x2   :  { %v1117_v2 = vld [vmem:[%s1593_s0 + $0x60] sm:$0xff]   ;;  %902 = vst [vmem:[%s1594_s1] sm:$0xff] %v1115_v0  ;;  %v1118_v3 = vld [vmem:[%s1593_s0 + $0x150] sm:$0xff]   ;;  %906 = vst [vmem:[%s1594_s1 + $0x90] sm:$0xff] %v1116_v1 }
   0x3   :  { %910 = vst [vmem:[%s1594_s1 + $0x120] sm:$0xff] %v1117_v2  ;;  %v1119_v4 = vld [vmem:[%s1593_s0 + $0xc0] sm:$0xff]   ;;  %v1120_v5 = vld [vmem:[%s1593_s0 + $0x30] sm:$0xff]   ;;  %914 = vst [vmem:[%s1594_s1 + $0x30] sm:$0xff] %v1118_v3 }
   0x4   :  { %v1121_v6 = vld [vmem:[%s1593_s0 + $0x120] sm:$0xff]   ;;  %918 = vst [vmem:[%s1594_s1 + $0xc0] sm:$0xff] %v1119_v4  ;;  %922 = vst [vmem:[%s1594_s1 + $0x150] sm:$0xff] %v1120_v5  ;;  %v1122_v7 = vld [vmem:[%s1593_s0 + $0x90] sm:$0xff]  }
   0x5   :  { %v1123_v8 = vld [vmem:[%s1593_s0] sm:$0xff]   ;;  %926 = vst [vmem:[%s1594_s1 + $0x60] sm:$0xff] %v1121_v6  ;;  %v1124_v9 = vld [vmem:[%s1593_s0 + $0x18c] sm:$0xff]   ;;  %930 = vst [vmem:[%s1594_s1 + $0xf0] sm:$0xff] %v1122_v7 }
   0x6   :  { %934 = vst [vmem:[%s1594_s1 + $0x180] sm:$0xff] %v1123_v8  ;;  %v1125_v10 = vld [vmem:[%s1593_s0 + $0xfc] sm:$0xff]   ;;  %v1126_v11 = vld [vmem:[%s1593_s0 + $0x6c] sm:$0xff]   ;;  %938 = vst [vmem:[%s1594_s1 + $0xc] sm:$0xff] %v1124_v9 }
   0x7   :  { %v1127_v12 = vld [vmem:[%s1593_s0 + $0x15c] sm:$0xff]   ;;  %942 = vst [vmem:[%s1594_s1 + $0x9c] sm:$0xff] %v1125_v10  ;;  %946 = vst [vmem:[%s1594_s1 + $0x12c] sm:$0xff] %v1126_v11  ;;  %v1128_v13 = vld [vmem:[%s1593_s0 + $0xcc] sm:$0xff]  }
   0x8   :  { %v1129_v14 = vld [vmem:[%s1593_s0 + $0x3c] sm:$0xff]   ;;  %950 = vst [vmem:[%s1594_s1 + $0x3c] sm:$0xff] %v1127_v12  ;;  %v1130_v15 = vld [vmem:[%s1593_s0 + $0x12c] sm:$0xff]   ;;  %954 = vst [vmem:[%s1594_s1 + $0xcc] sm:$0xff] %v1128_v13 }
   0x9   :  { %958 = vst [vmem:[%s1594_s1 + $0x15c] sm:$0xff] %v1129_v14  ;;  %v1131_v16 = vld [vmem:[%s1593_s0 + $0x9c] sm:$0xff]   ;;  %v1132_v17 = vld [vmem:[%s1593_s0 + $0xc] sm:$0xff]   ;;  %962 = vst [vmem:[%s1594_s1 + $0x6c] sm:$0xff] %v1130_v15 }
   0xa   :  { %966 = vst [vmem:[%s1594_s1 + $0xfc] sm:$0xff] %v1131_v16  ;;  %970 = vst [vmem:[%s1594_s1 + $0x18c] sm:$0xff] %v1132_v17  ;;  %v1134_v19 = vld [vmem:[%s1593_s0 + $0x108] sm:$0xff]   ;;  %v1135_v20 = vld [vmem:[%s1593_s0 + $0x78] sm:$0xff]  }
   0xb   :  { %974 = vst [vmem:[%s1594_s1 + $0x18] sm:$0xff] %v1133_v18  ;;  %v1136_v21 = vld [vmem:[%s1593_s0 + $0x168] sm:$0xff]   ;;  %978 = vst [vmem:[%s1594_s1 + $0xa8] sm:$0xff] %v1134_v19  ;;  %v1137_v22 = vld [vmem:[%s1593_s0 + $0xd8] sm:$0xff]  }
   0xc   :  { %982 = vst [vmem:[%s1594_s1 + $0x138] sm:$0xff] %v1135_v20  ;;  %v1138_v23 = vld [vmem:[%s1593_s0 + $0x48] sm:$0xff]   ;;  %986 = vst [vmem:[%s1594_s1 + $0x48] sm:$0xff] %v1136_v21  ;;  %v1139_v24 = vld [vmem:[%s1593_s0 + $0x138] sm:$0xff]  }
   0xd   :  { %990 = vst [vmem:[%s1594_s1 + $0xd8] sm:$0xff] %v1137_v22  ;;  %994 = vst [vmem:[%s1594_s1 + $0x168] sm:$0xff] %v1138_v23  ;;  %v1140_v25 = vld [vmem:[%s1593_s0 + $0xa8] sm:$0xff]   ;;  %v1141_v26 = vld [vmem:[%s1593_s0 + $0x18] sm:$0xff]  }
   0xe   :  { %998 = vst [vmem:[%s1594_s1 + $0x78] sm:$0xff] %v1139_v24  ;;  %v1142_v27 = vld [vmem:[%s1593_s0 + $0x1a4] sm:$0xff]   ;;  %1002 = vst [vmem:[%s1594_s1 + $0x108] sm:$0xff] %v1140_v25  ;;  %v1143_v28 = vld [vmem:[%s1593_s0 + $0x114] sm:$0xff]  }
   0xf   :  { %1006 = vst [vmem:[%s1594_s1 + $0x198] sm:$0xff] %v1141_v26  ;;  %v1144_v29 = vld [vmem:[%s1593_s0 + $0x84] sm:$0xff]   ;;  %1010 = vst [vmem:[%s1594_s1 + $0x24] sm:$0xff] %v1142_v27  ;;  %v1145_v30 = vld [vmem:[%s1593_s0 + $0x174] sm:$0xff]  }
  0x10   :  { %1014 = vst [vmem:[%s1594_s1 + $0xb4] sm:$0xff] %v1143_v28  ;;  %1018 = vst [vmem:[%s1594_s1 + $0x144] sm:$0xff] %v1144_v29  ;;  %v1146_v31 = vld [vmem:[%s1593_s0 + $0xe4] sm:$0xff]   ;;  %v1147_v32 = vld [vmem:[%s1593_s0 + $0x54] sm:$0xff]  }
  0x11   :  { %1022 = vst [vmem:[%s1594_s1 + $0x54] sm:$0xff] %v1145_v30  ;;  %v1148_v33 = vld [vmem:[%s1593_s0 + $0x144] sm:$0xff]   ;;  %1026 = vst [vmem:[%s1594_s1 + $0xe4] sm:$0xff] %v1146_v31  ;;  %v1149_v34 = vld [vmem:[%s1593_s0 + $0xb4] sm:$0xff]  }
  0x12   :  { %1030 = vst [vmem:[%s1594_s1 + $0x174] sm:$0xff] %v1147_v32  ;;  %v1150_v35 = vld [vmem:[%s1593_s0 + $0x24] sm:$0xff]   ;;  %1034 = vst [vmem:[%s1594_s1 + $0x84] sm:$0xff] %v1148_v33  ;;  %v1045_v37 = vld [vmem:[%s1593_s0 + $0xf8] sm:$0xf] }
  0x13   :  { %v1043_v36 = vld [vmem:[%s1593_s0 + $0x188] sm:$0xf]  ;;  %1038 = vst [vmem:[%s1594_s1 + $0x114] sm:$0xff] %v1149_v34  ;;  %1042 = vst [vmem:[%s1594_s1 + $0x1a4] sm:$0xff] %v1150_v35  ;;  %v1049_v39 = vld [vmem:[%s1593_s0 + $0x158] sm:$0xf] }
  0x14   :  { %v1047_v38 = vld [vmem:[%s1593_s0 + $0x68] sm:$0xf]  ;;  %1044 = vst [vmem:[%s1594_s1 + $0x8] sm:$0xf] %v1043_v36  ;;  %1046 = vst [vmem:[%s1594_s1 + $0x98] sm:$0xf] %v1045_v37 }
  0x15   :  { %1048 = vst [vmem:[%s1594_s1 + $0x128] sm:$0xf] %v1047_v38  ;;  %v1051_v40 = vld [vmem:[%s1593_s0 + $0xc8] sm:$0xf]  ;;  %v1053_v41 = vld [vmem:[%s1593_s0 + $0x38] sm:$0xf] }
  0x16   :  { %1050 = vst [vmem:[%s1594_s1 + $0x38] sm:$0xf] %v1049_v39  ;;  %1052 = vst [vmem:[%s1594_s1 + $0xc8] sm:$0xf] %v1051_v40  ;;  %v1055_v42 = vld [vmem:[%s1593_s0 + $0x128] sm:$0xf] }
  0x17   :  { %1054 = vst [vmem:[%s1594_s1 + $0x158] sm:$0xf] %v1053_v41  ;;  %v1057_v43 = vld [vmem:[%s1593_s0 + $0x98] sm:$0xf]  ;;  %v1059_v44 = vld [vmem:[%s1593_s0 + $0x8] sm:$0xf] }
  0x18   :  { %1056 = vst [vmem:[%s1594_s1 + $0x68] sm:$0xf] %v1055_v42  ;;  %1058 = vst [vmem:[%s1594_s1 + $0xf8] sm:$0xf] %v1057_v43  ;;  %v1061_v45 = vld [vmem:[%s1593_s0 + $0x194] sm:$0xf] }
  0x19   :  { %1060 = vst [vmem:[%s1594_s1 + $0x188] sm:$0xf] %v1059_v44  ;;  %v1063_v46 = vld [vmem:[%s1593_s0 + $0x104] sm:$0xf]  ;;  %v1065_v47 = vld [vmem:[%s1593_s0 + $0x74] sm:$0xf] }
  0x1a   :  { %1062 = vst [vmem:[%s1594_s1 + $0x14] sm:$0xf] %v1061_v45  ;;  %1064 = vst [vmem:[%s1594_s1 + $0xa4] sm:$0xf] %v1063_v46  ;;  %v1067_v48 = vld [vmem:[%s1593_s0 + $0x164] sm:$0xf] }
  0x1b   :  { %1066 = vst [vmem:[%s1594_s1 + $0x134] sm:$0xf] %v1065_v47  ;;  %v1069_v49 = vld [vmem:[%s1593_s0 + $0xd4] sm:$0xf]  ;;  %v1071_v50 = vld [vmem:[%s1593_s0 + $0x44] sm:$0xf] }
  0x1c   :  { %1068 = vst [vmem:[%s1594_s1 + $0x44] sm:$0xf] %v1067_v48  ;;  %1070 = vst [vmem:[%s1594_s1 + $0xd4] sm:$0xf] %v1069_v49  ;;  %v1073_v51 = vld [vmem:[%s1593_s0 + $0x134] sm:$0xf] }
  0x1d   :  { %1072 = vst [vmem:[%s1594_s1 + $0x164] sm:$0xf] %v1071_v50  ;;  %v1075_v52 = vld [vmem:[%s1593_s0 + $0xa4] sm:$0xf]  ;;  %v1077_v53 = vld [vmem:[%s1593_s0 + $0x14] sm:$0xf] }
  0x1e   :  { %1074 = vst [vmem:[%s1594_s1 + $0x74] sm:$0xf] %v1073_v51  ;;  %1076 = vst [vmem:[%s1594_s1 + $0x104] sm:$0xf] %v1075_v52  ;;  %v1079_v54 = vld [vmem:[%s1593_s0 + $0x1a0] sm:$0xf] }
  0x1f   :  { %1078 = vst [vmem:[%s1594_s1 + $0x194] sm:$0xf] %v1077_v53  ;;  %v1081_v55 = vld [vmem:[%s1593_s0 + $0x110] sm:$0xf]  ;;  %v1083_v56 = vld [vmem:[%s1593_s0 + $0x80] sm:$0xf] }
  0x20   :  { %1080 = vst [vmem:[%s1594_s1 + $0x20] sm:$0xf] %v1079_v54  ;;  %1082 = vst [vmem:[%s1594_s1 + $0xb0] sm:$0xf] %v1081_v55  ;;  %v1085_v57 = vld [vmem:[%s1593_s0 + $0x170] sm:$0xf] }
  0x21   :  { %1084 = vst [vmem:[%s1594_s1 + $0x140] sm:$0xf] %v1083_v56  ;;  %v1087_v58 = vld [vmem:[%s1593_s0 + $0xe0] sm:$0xf]  ;;  %v1089_v59 = vld [vmem:[%s1593_s0 + $0x50] sm:$0xf] }
  0x22   :  { %1086 = vst [vmem:[%s1594_s1 + $0x50] sm:$0xf] %v1085_v57  ;;  %1088 = vst [vmem:[%s1594_s1 + $0xe0] sm:$0xf] %v1087_v58  ;;  %v1091_v60 = vld [vmem:[%s1593_s0 + $0x140] sm:$0xf] }
  0x23   :  { %1090 = vst [vmem:[%s1594_s1 + $0x170] sm:$0xf] %v1089_v59  ;;  %v1093_v61 = vld [vmem:[%s1593_s0 + $0xb0] sm:$0xf]  ;;  %v1095_v62 = vld [vmem:[%s1593_s0 + $0x20] sm:$0xf] }
  0x24   :  { %1092 = vst [vmem:[%s1594_s1 + $0x80] sm:$0xf] %v1091_v60  ;;  %1094 = vst [vmem:[%s1594_s1 + $0x110] sm:$0xf] %v1093_v61  ;;  %v1097_v63 = vld [vmem:[%s1593_s0 + $0x1ac] sm:$0xf] }
  0x25   :  { %1096 = vst [vmem:[%s1594_s1 + $0x1a0] sm:$0xf] %v1095_v62  ;;  %v1099_v0 = vld [vmem:[%s1593_s0 + $0x11c] sm:$0xf]  ;;  %v1101_v1 = vld [vmem:[%s1593_s0 + $0x8c] sm:$0xf] }
  0x26   :  { %1098 = vst [vmem:[%s1594_s1 + $0x2c] sm:$0xf] %v1097_v63  ;;  %1100 = vst [vmem:[%s1594_s1 + $0xbc] sm:$0xf] %v1099_v0  ;;  %v1103_v2 = vld [vmem:[%s1593_s0 + $0x17c] sm:$0xf] }
  0x27   :  { %1102 = vst [vmem:[%s1594_s1 + $0x14c] sm:$0xf] %v1101_v1  ;;  %v1105_v3 = vld [vmem:[%s1593_s0 + $0xec] sm:$0xf]  ;;  %v1107_v4 = vld [vmem:[%s1593_s0 + $0x5c] sm:$0xf] }
  0x28   :  { %1104 = vst [vmem:[%s1594_s1 + $0x5c] sm:$0xf] %v1103_v2  ;;  %1106 = vst [vmem:[%s1594_s1 + $0xec] sm:$0xf] %v1105_v3  ;;  %v1109_v5 = vld [vmem:[%s1593_s0 + $0x14c] sm:$0xf] }
  0x29   :  { %1108 = vst [vmem:[%s1594_s1 + $0x17c] sm:$0xf] %v1107_v4  ;;  %v1111_v6 = vld [vmem:[%s1593_s0 + $0xbc] sm:$0xf]  ;;  %v1113_v7 = vld [vmem:[%s1593_s0 + $0x2c] sm:$0xf] }
  0x2a   :  { %1110 = vst [vmem:[%s1594_s1 + $0x8c] sm:$0xf] %v1109_v5  ;;  %1112 = vst [vmem:[%s1594_s1 + $0x11c] sm:$0xf] %v1111_v6 }
  0x2b   :  { %1114 = vst [vmem:[%s1594_s1 + $0x1ac] sm:$0xf] %v1113_v7 }

// kernel: _lambda_.11
= control target key start
LH: loop header
LB: loop body
LE: loop exit
PB: predicated region body
PF: predicated region fallthrough
CT: control target
= control target key end

     0   :  { %s508_s12 = smov 0   ;;  %s510_s13 = smov 0   ;;  %s610_s0 = inlined_call_operand.vmem [shape: bf16[32,512], index: 0, kind: input, shape index: {}]   ;;  %s611_s1 = inlined_call_operand.vmem [shape: f32[32,1], index: 1, kind: input, shape index: {}]   ;;  %s612_s2 = inlined_call_operand.vmem [shape: f32[32,1], index: 2, kind: input, shape index: {}]   ;;  %s613_s3 = inlined_call_operand.vmem [shape: f32[32,512], index: 3, kind: output, shape index: {}]  }
   0x1   :  { %s512_s14 = smov 0  }
   0x2 LB: > { %s419_s15 = sadd.s32 4294967295, %s485_s14   ;;  %s525_s16 = sadd.s32 1, %s485_s14   ;;  %s485_s14 = sphi %s512_s14, %s617_s14   ;;  %s481_s13 = sphi %s510_s13, %s616_s13   ;;  %s477_s12 = sphi %s508_s12, %s615_s12  }
   0x3   : > { %s17_s17 = ssub.s32 %s485_s14, %s525_s16  ;;  %s20_s18 = sadd.s32 1, %s481_s13 }
   0x4   : > { %p18_p0 = scmp.eq.s32.totalorder %s17_s17, 0  ;;  %p27_p1 = scmp.ne.s32.totalorder %s481_s13, %s477_s12 }
   0x5   : > { %p28_p2 = scmp.eq.s32.totalorder %s485_s14, 0  ;;  %p99_p3 = scmp.eq.s32.totalorder %s419_s15, 1 }
   0x6   : > { %s536_s19 = scalar_select %p18_p0, %s481_s13, %s20_s18  }
   0x7   : > { %p29_p4 = por %p28_p2, %p27_p1  ;;  %p538_p5 = por %p99_p3, %p27_p1 }
   0x8   : > { %p422_p6 = scmp.ge.s32.totalorder %s485_s14, 2 }
   0xa   : > { %127 = sbr.rel (%p422_p6) target bundleno = 24 (0x18), region = 24 }
  0x11   : > { %130 = sbr.rel (!%p29_p4) target bundleno = 24 (0x18), region = 28  ;;  %s132_s21 = sand.u32 (%p29_p4), 1, %s481_s13  }
  0x12   : > { %s434_s22 = sshll.u32 (%p29_p4), %s485_s14, 3  ;;  %s423_s23 = sshll.u32 (%p29_p4), %s132_s21, 5 }
  0x13   : > { %s137_s26 = scalar_lea.vmem (%p29_p4), %s610_s0, %s434_s22  ;;  %s134_s27 = scalar_lea.vmem (%p29_p4), [#allocation2], %s423_s23 }
  0x14   : > { %v171_v0 = vld [vmem:[%s137_s26] sm:$0xff] (%p29_p4)  ;;  %v173_v1 = vld [vmem:[%s137_s26 + $0x10] sm:$0xff] (%p29_p4) }
  0x15   : > { %v175_v2 = vld [vmem:[%s137_s26 + $0x20] sm:$0xff] (%p29_p4)  ;;  %172 = vst [vmem:[%s134_s27] sm:$0xff] (%p29_p4), %v171_v0  ;;  %174 = vst [vmem:[%s134_s27 + $0x8] sm:$0xff] (%p29_p4), %v173_v1  ;;  %v177_v3 = vld [vmem:[%s137_s26 + $0x30] sm:$0xff] (%p29_p4) }
  0x16   : > { %176 = vst [vmem:[%s134_s27 + $0x10] sm:$0xff] (%p29_p4), %v175_v2  ;;  %178 = vst [vmem:[%s134_s27 + $0x18] sm:$0xff] (%p29_p4), %v177_v3 }
  0x18 PF: > { %p426_p7 = scmp.ge.s32.totalorder %s485_s14, 1  ;;  %p183_p8 = scmp.lt.s32.totalorder %s485_s14, 3 }
  0x1a   : > { %p184_p9 = pnand %p426_p7, %p183_p8 }
  0x1b   : > { %v228_v4 = vld [vmem:[%s611_s1 + $0x10] sm:$0xff] (!%p184_p9)  ;;  %v226_v5 = vld [vmem:[%s611_s1] sm:$0xff] (!%p184_p9)  ;;  %v487_v6 = vmov (!%p184_p9), 0   ;;  %v229_v7 = vld [vmem:[%s611_s1 + $0x18] sm:$0xff] (!%p184_p9)  ;;  %s190_s24 = sand.u32 (!%p184_p9), 1, %s477_s12  }
  0x1c   : > { %187 = sbr.rel (%p184_p9) target bundleno = 185 (0xb9), region = 66  ;;  %462 = vset.pattern.permute.xlu1 (!%p184_p9), %v487_v6  ;;  %461 = vset.pattern.permute.xlu0 (!%p184_p9), %v487_v6  ;;  %v227_v8 = vld [vmem:[%s611_s1 + $0x8] sm:$0xff] (!%p184_p9)  ;;  %v258_v10 = vld [vmem:[%s612_s2] sm:$0xff] (!%p184_p9)  ;;  %v261_v11 = vld [vmem:[%s612_s2 + $0x18] sm:$0xff] (!%p184_p9)  ;;  %s427_s25 = sshll.u32 (!%p184_p9), %s190_s24, 5 }
  0x1d   : > { %242 = vperm.xlu1 (!%p184_p9), %462, %v228_v4   ;;  %232 = vperm.xlu0 (!%p184_p9), %461, %v226_v5   ;;  %v259_v9 = vld [vmem:[%s612_s2 + $0x8] sm:$0xff] (!%p184_p9)  ;;  %v260_v12 = vld [vmem:[%s612_s2 + $0x10] sm:$0xff] (!%p184_p9)  ;;  %s192_s26 = scalar_lea.vmem (!%p184_p9), [#allocation2], %s427_s25  ;;  %s428_s27 = sshll.u32 (!%p184_p9), %s190_s24, 6 }
  0x1e   : > { %v214_v15 = vld [vmem:[%s192_s26] sm:$0xff] (!%p184_p9)  ;;  %v215_v16 = vld [vmem:[%s192_s26 + $0x8] sm:$0xff] (!%p184_p9)  ;;  %v216_v17 = vld [vmem:[%s192_s26 + $0x10] sm:$0xff] (!%p184_p9)  ;;  %s575_s12 = scalar_lea.vmem (!%p184_p9), [#allocation3], %s428_s27 }
  0x1f   : > { %v218_v18 = vunpack.c.l.bf16 (!%p184_p9), %v214_v15  ;;  %v219_v19 = vunpack.c.h.bf16 (!%p184_p9), %v214_v15  ;;  %v217_v20 = vld [vmem:[%s192_s26 + $0x18] sm:$0xff] (!%p184_p9)  ;;  %v220_v21 = vunpack.c.l.bf16 (!%p184_p9), %v215_v16  ;;  %v221_v22 = vunpack.c.h.bf16 (!%p184_p9), %v215_v16 }
  0x20   : > { %v222_v25 = vunpack.c.l.bf16 (!%p184_p9), %v216_v17  ;;  %v223_v26 = vunpack.c.h.bf16 (!%p184_p9), %v216_v17  ;;  %v224_v27 = vunpack.c.l.bf16 (!%p184_p9), %v217_v20  ;;  %v225_v28 = vunpack.c.h.bf16 (!%p184_p9), %v217_v20 }
  0x21   : > { %247 = vperm.xlu1 (!%p184_p9), %462, %v229_v7   ;;  %237 = vperm.xlu0 (!%p184_p9), %461, %v227_v8  }
  0x23   : > { %s435_s28 = sshll.u32 (%p538_p5), %s419_s15, 4 }
  0x24   : > { %s331_s4 = scalar_lea.vmem (%p538_p5), %s613_s3, %s435_s28 }
  0x25   : > { %269 = vperm.xlu1 %462, %v259_v9   ;;  %264 = vperm.xlu0 %461, %v258_v10  }
  0x29   : > { %279 = vperm.xlu1 %462, %v261_v11   ;;  %274 = vperm.xlu0 %461, %v260_v12  }
  0x9c   : > { %v243_v13 = vpop.permute.xlu1 %242  ;;  %v233_v14 = vpop.permute.xlu0 %232 }
  0x9d   : > { %v250_v29 = vmul.f32 %v233_v14, %v218_v18  ;;  %v251_v30 = vmul.f32 %v233_v14, %v219_v19  ;;  %v254_v39 = vmul.f32 %v243_v13, %v222_v25  ;;  %v255_v40 = vmul.f32 %v243_v13, %v223_v26 }
  0xa0   : > { %v248_v23 = vpop.permute.xlu1 %247  ;;  %v238_v24 = vpop.permute.xlu0 %237 }
  0xa1   : > { %v252_v31 = vmul.f32 %v238_v24, %v220_v21  ;;  %v253_v32 = vmul.f32 %v238_v24, %v221_v22  ;;  %v256_v41 = vmul.f32 %v248_v23, %v224_v27  ;;  %v257_v42 = vmul.f32 %v248_v23, %v225_v28 }
  0xa4   : > { %v270_v33 = vpop.permute.xlu1 %269  ;;  %v265_v34 = vpop.permute.xlu0 %264 }
  0xa5   : > { %v284_v35 = vadd.f32 %v270_v33, %v252_v31  ;;  %v285_v36 = vadd.f32 %v270_v33, %v253_v32  ;;  %v282_v37 = vadd.f32 %v265_v34, %v250_v29  ;;  %v283_v38 = vadd.f32 %v265_v34, %v251_v30 }
  0xa7   : > { %vm292_vm0 = vcmp.gt.f32.partialorder %v284_v35, 0.0  ;;  %vm293_vm1 = vcmp.gt.f32.partialorder %v285_v36, 0.0  ;;  %v300_v43 = vmul.f32 0.01, %v284_v35  ;;  %v301_v44 = vmul.f32 0.01, %v285_v36 }
  0xa8   : > { %vm290_vm2 = vcmp.gt.f32.partialorder %v282_v37, 0.0  ;;  %vm291_vm3 = vcmp.gt.f32.partialorder %v283_v38, 0.0  ;;  %v298_v45 = vmul.f32 0.01, %v282_v37  ;;  %v299_v46 = vmul.f32 0.01, %v283_v38  ;;  %v280_v47 = vpop.permute.xlu1 %279  ;;  %v275_v48 = vpop.permute.xlu0 %274 }
  0xa9   : > { %v308_v49 = vsel %vm292_vm0, %v284_v35, %v300_v43  ;;  %v309_v50 = vsel %vm293_vm1, %v285_v36, %v301_v44  ;;  %v288_v51 = vadd.f32 %v280_v47, %v256_v41  ;;  %v289_v52 = vadd.f32 %v280_v47, %v257_v42 }
  0xaa   : > { %316 = vst [vmem:[%s575_s12 + $0x10] sm:$0xff] %v308_v49  ;;  %317 = vst [vmem:[%s575_s12 + $0x18] sm:$0xff] %v309_v50  ;;  %v306_v53 = vsel %vm290_vm2, %v282_v37, %v298_v45  ;;  %v307_v54 = vsel %vm291_vm3, %v283_v38, %v299_v46  ;;  %v286_v55 = vadd.f32 %v275_v48, %v254_v39  ;;  %328 = sbr.rel (!%p538_p5) target bundleno = 185 (0xb9), region = 74 }
  0xab   : > { %v287_v56 = vadd.f32 %v275_v48, %v255_v40  ;;  %314 = vst [vmem:[%s575_s12] sm:$0xff] %v306_v53  ;;  %315 = vst [vmem:[%s575_s12 + $0x8] sm:$0xff] %v307_v54  ;;  %vm296_vm4 = vcmp.gt.f32.partialorder %v288_v51, 0.0  ;;  %vm297_vm5 = vcmp.gt.f32.partialorder %v289_v52, 0.0  ;;  %v304_v57 = vmul.f32 0.01, %v288_v51 }
  0xac   : > { %v305_v58 = vmul.f32 0.01, %v289_v52  ;;  %vm294_vm6 = vcmp.gt.f32.partialorder %v286_v55, 0.0  ;;  %v302_v59 = vmul.f32 0.01, %v286_v55 }
  0xad   : > { %vm295_vm7 = vcmp.gt.f32.partialorder %v287_v56, 0.0  ;;  %v303_v60 = vmul.f32 0.01, %v287_v56  ;;  %v312_v61 = vsel %vm296_vm4, %v288_v51, %v304_v57 }
  0xae   : > { %v313_v62 = vsel %vm297_vm5, %v289_v52, %v305_v58  ;;  %320 = vst [vmem:[%s575_s12 + $0x30] sm:$0xff] %v312_v61  ;;  %v310_v63 = vsel %vm294_vm6, %v286_v55, %v302_v59 }
  0xaf   : > { %321 = vst [vmem:[%s575_s12 + $0x38] sm:$0xff] %v313_v62  ;;  %v311_v0 = vsel %vm295_vm7, %v287_v56, %v303_v60  ;;  %318 = vst [vmem:[%s575_s12 + $0x20] sm:$0xff] %v310_v63 }
  0xb0   : > { %319 = vst [vmem:[%s575_s12 + $0x28] sm:$0xff] %v311_v0 }
  0xb1   : > { %v348_v3 = vld [vmem:[%s575_s12 + $0x10] sm:$0xff]  ;;  %v350_v4 = vld [vmem:[%s575_s12 + $0x18] sm:$0xff] }
  0xb2   : > { %v344_v1 = vld [vmem:[%s575_s12] sm:$0xff]  ;;  %v346_v2 = vld [vmem:[%s575_s12 + $0x8] sm:$0xff]  ;;  %349 = vst [vmem:[%s331_s4 + $0x20] sm:$0xff] %v348_v3  ;;  %351 = vst [vmem:[%s331_s4 + $0x28] sm:$0xff] %v350_v4 }
  0xb3   : > { %345 = vst [vmem:[%s331_s4] sm:$0xff] %v344_v1  ;;  %347 = vst [vmem:[%s331_s4 + $0x8] sm:$0xff] %v346_v2 }
  0xb5   : > { %v356_v7 = vld [vmem:[%s575_s12 + $0x30] sm:$0xff] }
  0xb6   : > { %v352_v5 = vld [vmem:[%s575_s12 + $0x20] sm:$0xff]  ;;  %v358_v8 = vld [vmem:[%s575_s12 + $0x38] sm:$0xff]  ;;  %357 = vst [vmem:[%s331_s4 + $0x60] sm:$0xff] %v356_v7 }
  0xb7   : > { %v354_v6 = vld [vmem:[%s575_s12 + $0x28] sm:$0xff]  ;;  %353 = vst [vmem:[%s331_s4 + $0x40] sm:$0xff] %v352_v5  ;;  %359 = vst [vmem:[%s331_s4 + $0x68] sm:$0xff] %v358_v8 }
  0xb8   : > { %355 = vst [vmem:[%s331_s4 + $0x48] sm:$0xff] %v354_v6 }
  0xb9 PF: > { %p10_p10 = scmp.ge.s32.totalorder %s525_s16, 4   ;;  %s615_s12 = smov %s481_s13 }
  0xba   : > { %s616_s13 = smov %s536_s19  ;;  %s617_s14 = smov %s525_s16 }
  0xbb   :  { %12 = sbr.rel (!%p10_p10) target bundleno = 2 (0x2), region = 128 }

// kernel: _lambda_.10
= control target key start
LH: loop header
LB: loop body
LE: loop exit
PB: predicated region body
PF: predicated region fallthrough
CT: control target
= control target key end

     0   :  { %s1377_s15 = smov 0   ;;  %s1379_s16 = smov 0   ;;  %s1613_s0 = inlined_call_operand.vmem [shape: bf16[32,288], index: 0, kind: input, shape index: {}]   ;;  %s1614_s1 = inlined_call_operand.vmem [shape: bf16[288,512], index: 1, kind: input, shape index: {}]   ;;  %s1615_s2 = inlined_call_operand.vmem [shape: bf16[32,512], index: 2, kind: output, shape index: {0}]   ;;  %s1616_s3 = inlined_call_operand.vmem [shape: f32[2,32,1], index: 3, kind: output, shape index: {1}]   ;;  %s1617_s4 = inlined_call_operand.vmem [shape: f32[2,32,1], index: 4, kind: output, shape index: {2}]  }
   0x1   :  { %s1381_s17 = smov 0   ;;  %s1383_s18 = smov 0  }
   0x2   :  { %s1385_s19 = smov 0  }
   0x3 LB: > { %s27_s20 = sadd.s32 1, %s1345_s18  ;;  %s1125_s21 = sadd.s32 4294967295, %s1349_s19   ;;  %s1349_s19 = sphi %s1385_s19, %s15_s19   ;;  %s1345_s18 = sphi %s1383_s18, %s1622_s18   ;;  %s1341_s17 = sphi %s1381_s17, %s1621_s17   ;;  %s1337_s16 = sphi %s1379_s16, %s1620_s16   ;;  %s1333_s15 = sphi %s1377_s15, %s1619_s15  }
   0x4   : > { %p29_p0 = scmp.ge.s32.totalorder %s27_s20, 2  ;;  %p64_p1 = scmp.ne.s32.totalorder %s1337_s16, %s1333_s15 }
   0x5   : > { %p65_p2 = scmp.eq.s32.totalorder %s1349_s19, 0  ;;  %p96_p4 = scmp.eq.s32.totalorder %s1125_s21, 1 }
   0x6   : > { %s1624_s20 = smov (%p29_p0, %s27_s20), 0  ;;  %s57_s23 = sadd.s32 1, %s1337_s16 }
   0x7   : > { %p66_p3 = por %p65_p2, %p64_p1  ;;  %s54_s22 = ssub.s32 %s1345_s18, %s1624_s20 }
   0x8   : > { %p55_p5 = scmp.eq.s32.totalorder %s54_s22, 0  ;;  %p1412_p6 = por %p96_p4, %p64_p1 }
   0x9   : > { %p1128_p7 = scmp.ge.s32.totalorder %s1349_s19, 2 }
   0xa   : > { %s1417_s25 = scalar_select %p55_p5, %s1337_s16, %s57_s23  }
   0xb   : > { %173 = sbr.rel (%p1128_p7) target bundleno = 40 (0x28), region = 20 }
  0x12   : > { %176 = sbr.rel (!%p66_p3) target bundleno = 40 (0x28), region = 24  ;;  %s178_s26 = sand.u32 (%p66_p3), 1, %s1337_s16  }
  0x13   : > { %s1190_s27 = sshll.u32 (%p66_p3), %s1345_s18, 3  ;;  %s1206_s28 = smul.u32 (%p66_p3), 288, %s178_s26 }
  0x14   : > { %s1425_s5 = scalar_lea.vmem (%p66_p3), %s1614_s1, %s1190_s27 }
  0x15   : > { %v282_v0 = vld [vmem:[%s1425_s5] sm:$0xff] (%p66_p3)  ;;  %v284_v1 = vld [vmem:[%s1425_s5 + $0x10] sm:$0xff] (%p66_p3)  ;;  %s1433_s6 = scalar_lea.vmem (%p66_p3), [#allocation4], %s1206_s28 }
  0x16   : > { %v286_v2 = vld [vmem:[%s1425_s5 + $0x20] sm:$0xff] (%p66_p3)  ;;  %v288_v3 = vld [vmem:[%s1425_s5 + $0x30] sm:$0xff] (%p66_p3)  ;;  %283 = vst [vmem:[%s1433_s6] sm:$0xff] (%p66_p3), %v282_v0  ;;  %285 = vst [vmem:[%s1433_s6 + $0x8] sm:$0xff] (%p66_p3), %v284_v1 }
  0x17   : > { %v290_v4 = vld [vmem:[%s1425_s5 + $0x40] sm:$0xff] (%p66_p3)  ;;  %v292_v5 = vld [vmem:[%s1425_s5 + $0x50] sm:$0xff] (%p66_p3)  ;;  %287 = vst [vmem:[%s1433_s6 + $0x10] sm:$0xff] (%p66_p3), %v286_v2  ;;  %289 = vst [vmem:[%s1433_s6 + $0x18] sm:$0xff] (%p66_p3), %v288_v3 }
  0x18   : > { %291 = vst [vmem:[%s1433_s6 + $0x20] sm:$0xff] (%p66_p3), %v290_v4  ;;  %293 = vst [vmem:[%s1433_s6 + $0x28] sm:$0xff] (%p66_p3), %v292_v5  ;;  %v294_v6 = vld [vmem:[%s1425_s5 + $0x60] sm:$0xff] (%p66_p3)  ;;  %v296_v7 = vld [vmem:[%s1425_s5 + $0x70] sm:$0xff] (%p66_p3) }
  0x19   : > { %v298_v8 = vld [vmem:[%s1425_s5 + $0x80] sm:$0xff]  ;;  %295 = vst [vmem:[%s1433_s6 + $0x30] sm:$0xff] %v294_v6  ;;  %297 = vst [vmem:[%s1433_s6 + $0x38] sm:$0xff] %v296_v7  ;;  %v300_v9 = vld [vmem:[%s1425_s5 + $0x90] sm:$0xff] }
  0x1a   : > { %299 = vst [vmem:[%s1433_s6 + $0x40] sm:$0xff] %v298_v8  ;;  %v302_v10 = vld [vmem:[%s1425_s5 + $0xa0] sm:$0xff]  ;;  %v304_v11 = vld [vmem:[%s1425_s5 + $0xb0] sm:$0xff]  ;;  %301 = vst [vmem:[%s1433_s6 + $0x48] sm:$0xff] %v300_v9 }
  0x1b   : > { %303 = vst [vmem:[%s1433_s6 + $0x50] sm:$0xff] %v302_v10  ;;  %305 = vst [vmem:[%s1433_s6 + $0x58] sm:$0xff] %v304_v11  ;;  %v306_v12 = vld [vmem:[%s1425_s5 + $0xc0] sm:$0xff]  ;;  %v308_v13 = vld [vmem:[%s1425_s5 + $0xd0] sm:$0xff] }
  0x1c   : > { %v310_v14 = vld [vmem:[%s1425_s5 + $0xe0] sm:$0xff]  ;;  %307 = vst [vmem:[%s1433_s6 + $0x60] sm:$0xff] %v306_v12  ;;  %309 = vst [vmem:[%s1433_s6 + $0x68] sm:$0xff] %v308_v13  ;;  %v312_v15 = vld [vmem:[%s1425_s5 + $0xf0] sm:$0xff] }
  0x1d   : > { %311 = vst [vmem:[%s1433_s6 + $0x70] sm:$0xff] %v310_v14  ;;  %v314_v16 = vld [vmem:[%s1425_s5 + $0x100] sm:$0xff]  ;;  %v316_v17 = vld [vmem:[%s1425_s5 + $0x110] sm:$0xff]  ;;  %313 = vst [vmem:[%s1433_s6 + $0x78] sm:$0xff] %v312_v15 }
  0x1e   : > { %315 = vst [vmem:[%s1433_s6 + $0x80] sm:$0xff] %v314_v16  ;;  %317 = vst [vmem:[%s1433_s6 + $0x88] sm:$0xff] %v316_v17  ;;  %v318_v18 = vld [vmem:[%s1425_s5 + $0x120] sm:$0xff]  ;;  %v320_v19 = vld [vmem:[%s1425_s5 + $0x130] sm:$0xff] }
  0x1f   : > { %v322_v20 = vld [vmem:[%s1425_s5 + $0x140] sm:$0xff]  ;;  %319 = vst [vmem:[%s1433_s6 + $0x90] sm:$0xff] %v318_v18  ;;  %321 = vst [vmem:[%s1433_s6 + $0x98] sm:$0xff] %v320_v19  ;;  %v324_v21 = vld [vmem:[%s1425_s5 + $0x150] sm:$0xff] }
  0x20   : > { %323 = vst [vmem:[%s1433_s6 + $0xa0] sm:$0xff] %v322_v20  ;;  %v326_v22 = vld [vmem:[%s1425_s5 + $0x160] sm:$0xff]  ;;  %v328_v23 = vld [vmem:[%s1425_s5 + $0x170] sm:$0xff]  ;;  %325 = vst [vmem:[%s1433_s6 + $0xa8] sm:$0xff] %v324_v21 }
  0x21   : > { %327 = vst [vmem:[%s1433_s6 + $0xb0] sm:$0xff] %v326_v22  ;;  %329 = vst [vmem:[%s1433_s6 + $0xb8] sm:$0xff] %v328_v23  ;;  %v330_v24 = vld [vmem:[%s1425_s5 + $0x180] sm:$0xff]  ;;  %v332_v25 = vld [vmem:[%s1425_s5 + $0x190] sm:$0xff] }
  0x22   : > { %v334_v26 = vld [vmem:[%s1425_s5 + $0x1a0] sm:$0xff]  ;;  %331 = vst [vmem:[%s1433_s6 + $0xc0] sm:$0xff] %v330_v24  ;;  %333 = vst [vmem:[%s1433_s6 + $0xc8] sm:$0xff] %v332_v25  ;;  %v336_v27 = vld [vmem:[%s1425_s5 + $0x1b0] sm:$0xff] }
  0x23   : > { %335 = vst [vmem:[%s1433_s6 + $0xd0] sm:$0xff] %v334_v26  ;;  %v338_v28 = vld [vmem:[%s1425_s5 + $0x1c0] sm:$0xff]  ;;  %v340_v29 = vld [vmem:[%s1425_s5 + $0x1d0] sm:$0xff]  ;;  %337 = vst [vmem:[%s1433_s6 + $0xd8] sm:$0xff] %v336_v27 }
  0x24   : > { %339 = vst [vmem:[%s1433_s6 + $0xe0] sm:$0xff] %v338_v28  ;;  %341 = vst [vmem:[%s1433_s6 + $0xe8] sm:$0xff] %v340_v29  ;;  %v342_v30 = vld [vmem:[%s1425_s5 + $0x1e0] sm:$0xff]  ;;  %v344_v31 = vld [vmem:[%s1425_s5 + $0x1f0] sm:$0xff] }
  0x25   : > { %v346_v32 = vld [vmem:[%s1425_s5 + $0x200] sm:$0xff]  ;;  %343 = vst [vmem:[%s1433_s6 + $0xf0] sm:$0xff] %v342_v30  ;;  %345 = vst [vmem:[%s1433_s6 + $0xf8] sm:$0xff] %v344_v31  ;;  %v348_v33 = vld [vmem:[%s1425_s5 + $0x210] sm:$0xff] }
  0x26   : > { %347 = vst [vmem:[%s1433_s6 + $0x100] sm:$0xff] %v346_v32  ;;  %v350_v34 = vld [vmem:[%s1425_s5 + $0x220] sm:$0xff]  ;;  %v352_v35 = vld [vmem:[%s1425_s5 + $0x230] sm:$0xff]  ;;  %349 = vst [vmem:[%s1433_s6 + $0x108] sm:$0xff] %v348_v33 }
  0x27   : > { %351 = vst [vmem:[%s1433_s6 + $0x110] sm:$0xff] %v350_v34  ;;  %353 = vst [vmem:[%s1433_s6 + $0x118] sm:$0xff] %v352_v35 }
  0x28 PF: > { %p1131_p8 = scmp.ge.s32.totalorder %s1349_s19, 1  ;;  %p358_p9 = scmp.lt.s32.totalorder %s1349_s19, 3 }
  0x2a   : > { %p359_p10 = pnand %p1131_p8, %p358_p9 }
  0x2b   : > { %s365_s7 = sand.u32 (!%p359_p10), 1, %s1333_s15   ;;  %v1351_v36 = vmov (!%p359_p10), 0   ;;  %v1306_v37 = vld [vmem:[%s1613_s0 + $0x4] ss:$12 sps:$4 sm:$0xff] (!%p359_p10)   ;;  %v1303_v57 = vld [vmem:[%s1613_s0 + $0x8] ss:$12 sps:$4 sm:$0xff] (!%p359_p10)  }
  0x2c   : > { %362 = sbr.rel (%p359_p10) target bundleno = 489 (0x1e9), region = 62  ;;  %780 = vmatprep.mubr.bf16.mxu0 (!%p359_p10), %v1351_v36  ;;  %727 = vmatprep.mubr.bf16.mxu1 (!%p359_p10), %v1306_v37  ;;  %vm688_vm0 = vcmask (!%p359_p10), 261120   ;;  %v1307_v62 = vld [vmem:[%s1613_s0 + $0x20] ss:$12 sps:$4 sm:$0xff] (!%p359_p10)   ;;  %v1308_v13 = vld [vmem:[%s1613_s0 + $0x1c] ss:$12 sps:$4 sm:$0xff] (!%p359_p10)  }
  0x2d   : > { %s1207_s8 = smul.u32 (!%p359_p10), 288, %s365_s7  ;;  %v1304_v12 = vld [vmem:[%s1613_s0] ss:$12 sps:$4 sm:$0xff] (!%p359_p10)   ;;  %v1310_v14 = vld [vmem:[%s1613_s0 + $0x18] ss:$12 sps:$4 sm:$0xff] (!%p359_p10)   ;;  %s1132_s30 = sshll.u32 (!%p359_p10), %s365_s7, 5 }
  0x2e   : > { %s1566_s5 = scalar_lea.vmem (!%p359_p10), [#allocation5], %s1132_s30  ;;  %p403_p11 = scmp.lt.s32.totalorder (!%p359_p10), %s1341_s17, 1  ;;  %vm908_vm1 = vcmask (!%p359_p10), 7168  }
  0x2f   : > { %s1509_s11 = scalar_lea.vmem (!%p359_p10), [#allocation4], %s1207_s8 }
  0x30   : > { %v1249_v38 = vld [vmem:[%s1509_s11 + $0x4] ss:$8 sps:$4 sm:$0xff] (!%p359_p10)   ;;  %v1251_v39 = vld [vmem:[%s1509_s11] ss:$8 sps:$4 sm:$0xff] (!%p359_p10)   ;;  %v1252_v40 = vld [vmem:[%s1509_s11 + $0x14] ss:$8 sps:$4 sm:$0xff] (!%p359_p10)  }
  0x31   : > { %695 = vmatprep.subr.bf16.mxu1 (!%p359_p10), %v1249_v38  ;;  %v1254_v41 = vld [vmem:[%s1509_s11 + $0x10] ss:$8 sps:$4 sm:$0xff] (!%p359_p10)   ;;  %v1255_v42 = vld [vmem:[%s1509_s11 + $0x24] ss:$8 sps:$4 sm:$0xff] (!%p359_p10)   ;;  %v1257_v43 = vld [vmem:[%s1509_s11 + $0x20] ss:$8 sps:$4 sm:$0xff] (!%p359_p10)  }
  0x32   : > { %696 = vmatpush1.bf16.msra.mxu1 (!%p359_p10), %v1251_v39  ;;  %v1258_v44 = vld [vmem:[%s1509_s11 + $0x34] ss:$8 sps:$4 sm:$0xff] (!%p359_p10)   ;;  %v1260_v45 = vld [vmem:[%s1509_s11 + $0x30] ss:$8 sps:$4 sm:$0xff] (!%p359_p10)   ;;  %v1261_v46 = vld [vmem:[%s1509_s11 + $0x44] ss:$8 sps:$4 sm:$0xff] (!%p359_p10)  }
  0x33   : > { %697 = vmatprep.subr.bf16.mxu1 %v1252_v40  ;;  %v1263_v47 = vld [vmem:[%s1509_s11 + $0x40] ss:$8 sps:$4 sm:$0xff]   ;;  %v1264_v48 = vld [vmem:[%s1509_s11 + $0x54] ss:$8 sps:$4 sm:$0xff]   ;;  %v1266_v49 = vld [vmem:[%s1509_s11 + $0x50] ss:$8 sps:$4 sm:$0xff]  }
  0x34   : > { %v1291_v50 = vld [vmem:[%s1509_s11 + $0x104] ss:$8 sps:$4 sm:$0xff]   ;;  %v1293_v51 = vld [vmem:[%s1509_s11 + $0x100] ss:$8 sps:$4 sm:$0xff]   ;;  %v1297_v53 = vld [vmem:[%s1509_s11 + $0x114] ss:$8 sps:$4 sm:$0xff]  }
  0x35   : > { %v1267_v52 = vld [vmem:[%s1509_s11 + $0x64] ss:$8 sps:$4 sm:$0xff]   ;;  %748 = vmatprep.subr.bf16.mxu0 %v1291_v50  ;;  %v1299_v54 = vld [vmem:[%s1509_s11 + $0x110] ss:$8 sps:$4 sm:$0xff]   ;;  %v1269_v55 = vld [vmem:[%s1509_s11 + $0x60] ss:$8 sps:$4 sm:$0xff]  }
  0x36   : > { %698 = vmatpush1.bf16.msra.mxu1 %v1254_v41  ;;  %749 = vmatpush1.bf16.msra.mxu0 %v1293_v51  ;;  %v1270_v56 = vld [vmem:[%s1509_s11 + $0x74] ss:$8 sps:$4 sm:$0xff]   ;;  %v1272_v58 = vld [vmem:[%s1509_s11 + $0x70] ss:$8 sps:$4 sm:$0xff]   ;;  %v1273_v59 = vld [vmem:[%s1509_s11 + $0x84] ss:$8 sps:$4 sm:$0xff]  }
  0x37   : > { %699 = vmatprep.subr.bf16.mxu1 %v1255_v42  ;;  %750 = vmatprep.subr.bf16.mxu0 %v1297_v53  ;;  %v1275_v60 = vld [vmem:[%s1509_s11 + $0x80] ss:$8 sps:$4 sm:$0xff]   ;;  %v1276_v61 = vld [vmem:[%s1509_s11 + $0x94] ss:$8 sps:$4 sm:$0xff]   ;;  %v1278_v63 = vld [vmem:[%s1509_s11 + $0x90] ss:$8 sps:$4 sm:$0xff]  }
  0x38   : > { %v1279_v0 = vld [vmem:[%s1509_s11 + $0xa4] ss:$8 sps:$4 sm:$0xff]   ;;  %v1281_v1 = vld [vmem:[%s1509_s11 + $0xa0] ss:$8 sps:$4 sm:$0xff]   ;;  %v1282_v2 = vld [vmem:[%s1509_s11 + $0xb4] ss:$8 sps:$4 sm:$0xff]  }
  0x39   : > { %v1284_v3 = vld [vmem:[%s1509_s11 + $0xb0] ss:$8 sps:$4 sm:$0xff]   ;;  %v1285_v4 = vld [vmem:[%s1509_s11 + $0xc4] ss:$8 sps:$4 sm:$0xff]   ;;  %v1287_v5 = vld [vmem:[%s1509_s11 + $0xc0] ss:$8 sps:$4 sm:$0xff]  }
  0x3a   : > { %700 = vmatpush1.bf16.msra.mxu1 %v1257_v43  ;;  %751 = vmatpush1.bf16.msra.mxu0 %v1299_v54  ;;  %v1288_v6 = vld [vmem:[%s1509_s11 + $0xd4] ss:$8 sps:$4 sm:$0xff]   ;;  %v1290_v7 = vld [vmem:[%s1509_s11 + $0xd0] ss:$8 sps:$4 sm:$0xff]   ;;  %v1294_v8 = vld [vmem:[%s1509_s11 + $0xe4] ss:$8 sps:$4 sm:$0xff]  }
  0x3b   : > { %701 = vmatprep.subr.bf16.mxu1 %v1258_v44  ;;  %v1296_v9 = vld [vmem:[%s1509_s11 + $0xe0] ss:$8 sps:$4 sm:$0xff]   ;;  %v1300_v10 = vld [vmem:[%s1509_s11 + $0xf4] ss:$8 sps:$4 sm:$0xff]   ;;  %v1302_v11 = vld [vmem:[%s1509_s11 + $0xf0] ss:$8 sps:$4 sm:$0xff]  }
  0x3c   : > { %s404_s15 = scalar_select %p403_p11, %s1341_s17, 1 }
  0x3d   : > { %1179 = vmatmul.mubr.msk.bf16.vlgmr.msra.gmra.mrb[0].mxu0 %vm688_vm0, %v1303_v57  ;;  %s1197_s13 = sshll.u32 (%p1412_p6), %s1341_s17, 3 }
  0x3e   : > { %702 = vmatpush1.bf16.msra.mxu1 %v1260_v45  ;;  %790 = vmatprep.mubr.bf16.mxu0 %v1351_v36  ;;  %s1191_s6 = sshll.u32 %s404_s15, 5  ;;  %s957_s22 = scalar_lea.vmem (%p1412_p6), %s1615_s2, %s1197_s13 }
  0x3f   : > { %703 = vmatprep.subr.bf16.mxu1 %v1261_v46  ;;  %s407_s9 = scalar_lea.vmem %s1616_s3, %s1191_s6  ;;  %s412_s12 = scalar_lea.vmem %s1617_s4, %s1191_s6 }
  0x42   : > { %704 = vmatpush1.bf16.msra.mxu1 %v1263_v47 }
  0x43   : > { %705 = vmatprep.subr.bf16.mxu1 %v1264_v48 }
  0x45   : > { %1180 = vmatmul.mubr.msk.bf16.gmra.mrb[4].mxu0 %vm688_vm0, %v1307_v62 }
  0x46   : > { %706 = vmatpush1.bf16.msra.mxu1 %v1266_v49 }
  0x47   : > { %707 = vmatprep.subr.bf16.mxu1 %v1267_v52 }
  0x4a   : > { %708 = vmatpush1.bf16.msra.mxu1 %v1269_v55 }
  0x4b   : > { %709 = vmatprep.subr.bf16.mxu1 %v1270_v56 }
  0x4e   : > { %710 = vmatpush1.bf16.msra.mxu1 %v1272_v58 }
  0x4f   : > { %711 = vmatprep.subr.bf16.mxu1 %v1273_v59 }
  0x52   : > { %712 = vmatpush1.bf16.msra.mxu1 %v1275_v60 }
  0x53   : > { %713 = vmatprep.subr.bf16.mxu1 %v1276_v61 }
  0x56   : > { %714 = vmatpush1.bf16.msra.mxu1 %v1278_v63 }
  0x57   : > { %715 = vmatprep.subr.bf16.mxu1 %v1279_v0 }
  0x5a   : > { %716 = vmatpush1.bf16.msra.mxu1 %v1281_v1 }
  0x5b   : > { %717 = vmatprep.subr.bf16.mxu1 %v1282_v2 }
  0x5e   : > { %718 = vmatpush1.bf16.msra.mxu1 %v1284_v3 }
  0x5f   : > { %719 = vmatprep.subr.bf16.mxu1 %v1285_v4 }
  0x62   : > { %720 = vmatpush1.bf16.msra.mxu1 %v1287_v5 }
  0x63   : > { %721 = vmatprep.subr.bf16.mxu1 %v1288_v6 }
  0x66   : > { %722 = vmatpush1.bf16.msra.mxu1 %v1290_v7 }
  0x67   : > { %723 = vmatprep.subr.bf16.mxu1 %v1294_v8 }
  0x6a   : > { %724 = vmatpush1.bf16.msra.mxu1 %v1296_v9 }
  0x6b   : > { %725 = vmatprep.subr.bf16.mxu1 %v1300_v10 }
  0x6e   : > { %726 = vmatpush1.bf16.msra.mxu1 %v1302_v11 }
  0x71   : > { %728 = vmatmul.mubr.bf16.vlgmr.msra.gmra.mrb[0].mxu1 %v1304_v12 }
  0x72   : > { %737 = vmatprep.mubr.bf16.mxu1 %v1308_v13 }
  0x79   : > { %738 = vmatmul.mubr.bf16.gmra.mrb[4].mxu1 %v1310_v14 }
 0x110   : > { %v782_v15 = vpop.f32.mrb[0].mxu0 }
 0x111   : > { %v784_v16 = vpop.f32.mrb[1].mxu0 }
 0x112   : > { %v786_v17 = vpop.f32.mrb[2].mxu0 }
 0x113   : > { %v788_v18 = vpop.f32.mrb[3].mxu0 }
 0x118   : > { %v792_v19 = vpop.f32.mrb[4].mxu0 }
 0x119   : > { %v794_v20 = vpop.f32.mrb[5].mxu0 }
 0x11a   : > { %v796_v21 = vpop.f32.mrb[6].mxu0 }
 0x11b   : > { %v798_v22 = vpop.f32.mrb[7].mxu0 }
 0x144   : > { %v729_v23 = vpop.f32.mrb[0].mxu1 }
 0x145   : > { %v783_v24 = vadd.f32 %v782_v15, %v729_v23  ;;  %v731_v25 = vpop.f32.mrb[1].mxu1 }
 0x146   : > { %v785_v26 = vadd.f32 %v784_v16, %v731_v25  ;;  %v733_v27 = vpop.f32.mrb[2].mxu1 }
 0x147   : > { %v787_v28 = vadd.f32 %v786_v17, %v733_v27  ;;  %v735_v29 = vpop.f32.mrb[3].mxu1  ;;  %v861_v30 = vmul.f32 %v783_v24, %v783_v24 }
 0x148   : > { %v1193_v31 = vpack.c.bf16 %v785_v26, %v783_v24  ;;  %v789_v32 = vadd.f32 %v788_v18, %v735_v29  ;;  %v896_v33 = vadd.f32 %v785_v26, %v783_v24  ;;  %v862_v34 = vmul.f32 %v785_v26, %v785_v26 }
 0x149   : > { %v863_v35 = vmul.f32 %v787_v28, %v787_v28 }
 0x14a   : > { %825 = vst [vmem:[%s1566_s5] sm:$0xff] %v1193_v31  ;;  %v1194_v36 = vpack.c.bf16 %v789_v32, %v787_v28  ;;  %897 = vadd.xlane.f32.xlu0 %v896_v33  ;;  %v899_v37 = vadd.f32 %v789_v32, %v787_v28  ;;  %v864_v38 = vmul.f32 %v789_v32, %v789_v32 }
 0x14b   : > { %v921_v39 = vadd.f32 %v862_v34, %v861_v30 }
 0x14c   : > { %826 = vst [vmem:[%s1566_s5 + $0x8] sm:$0xff] %v1194_v36  ;;  %v739_v40 = vpop.f32.mrb[4].mxu1  ;;  %v924_v41 = vadd.f32 %v864_v38, %v863_v35 }
 0x14d   : > { %v793_v42 = vadd.f32 %v792_v19, %v739_v40  ;;  %v741_v43 = vpop.f32.mrb[5].mxu1 }
 0x14e   : > { %v795_v44 = vadd.f32 %v794_v20, %v741_v43  ;;  %900 = vadd.xlane.f32.xlu0 %v899_v37  ;;  %925 = vadd.xlane.f32.xlu1 %v924_v41  ;;  %v743_v45 = vpop.f32.mrb[6].mxu1 }
 0x14f   : > { %v797_v46 = vadd.f32 %v796_v21, %v743_v45  ;;  %v745_v47 = vpop.f32.mrb[7].mxu1  ;;  %v865_v48 = vmul.f32 %v793_v42, %v793_v42 }
 0x150   : > { %v1195_v49 = vpack.c.bf16 %v795_v44, %v793_v42  ;;  %v799_v50 = vadd.f32 %v798_v22, %v745_v47  ;;  %v902_v51 = vadd.f32 %v795_v44, %v793_v42  ;;  %v866_v52 = vmul.f32 %v795_v44, %v795_v44 }
 0x151   : > { %v867_v53 = vmul.f32 %v797_v46, %v797_v46  ;;  %v991_v3 = vld [vmem:[%s1566_s5] sm:$0xff] (%p1412_p6) }
 0x152   : > { %827 = vst [vmem:[%s1566_s5 + $0x10] sm:$0xff] %v1195_v49  ;;  %v1196_v54 = vpack.c.bf16 %v799_v50, %v797_v46  ;;  %922 = vadd.xlane.f32.xlu0 %v921_v39  ;;  %903 = vadd.xlane.f32.xlu1 %v902_v51  ;;  %v927_v55 = vadd.f32 %v866_v52, %v865_v48  ;;  %992 = vst [vmem:[%s957_s22] sm:$0xff] (%p1412_p6), %v991_v3 }
 0x153   : > { %v905_v56 = vadd.f32 %v799_v50, %v797_v46  ;;  %v868_v57 = vmul.f32 %v799_v50, %v799_v50  ;;  %v993_v4 = vld [vmem:[%s1566_s5 + $0x8] sm:$0xff] (%p1412_p6) }
 0x154   : > { %828 = vst [vmem:[%s1566_s5 + $0x18] sm:$0xff] %v1196_v54  ;;  %994 = vst [vmem:[%s957_s22 + $0x10] sm:$0xff] (%p1412_p6), %v993_v4 }
 0x155   : > { %v930_v58 = vadd.f32 %v868_v57, %v867_v53 }
 0x156   : > { %928 = vadd.xlane.f32.xlu0 %v927_v55  ;;  %906 = vadd.xlane.f32.xlu1 %v905_v56 }
 0x159   : > { %v995_v5 = vld [vmem:[%s1566_s5 + $0x10] sm:$0xff] (%p1412_p6) }
 0x15a   : > { %931 = vadd.xlane.f32.xlu1 %v930_v58  ;;  %996 = vst [vmem:[%s957_s22 + $0x20] sm:$0xff] (%p1412_p6), %v995_v5 }
 0x15b   : > { %v997_v6 = vld [vmem:[%s1566_s5 + $0x18] sm:$0xff] (%p1412_p6) }
 0x15c   : > { %998 = vst [vmem:[%s957_s22 + $0x30] sm:$0xff] (%p1412_p6), %v997_v6 }
 0x1d7   : > { %v898_v59 = vpop.xlane.xlu0 %897 }
 0x1d8   : > { %909 = vst.msk [vmem:[%s407_s9] sm:$0xff] %vm908_vm1, %v898_v59 }
 0x1db   : > { %v901_v60 = vpop.xlane.xlu0 %900  ;;  %v926_v61 = vpop.xlane.xlu1 %925 }
 0x1dc   : > { %910 = vst.msk [vmem:[%s407_s9 + $0x8] sm:$0xff] %vm908_vm1, %v901_v60  ;;  %934 = vst.msk [vmem:[%s412_s12 + $0x8] sm:$0xff] %vm908_vm1, %v926_v61 }
 0x1df   : > { %v923_v62 = vpop.xlane.xlu0 %922  ;;  %v904_v63 = vpop.xlane.xlu1 %903 }
 0x1e0   : > { %933 = vst.msk [vmem:[%s412_s12] sm:$0xff] %vm908_vm1, %v923_v62  ;;  %911 = vst.msk [vmem:[%s407_s9 + $0x10] sm:$0xff] %vm908_vm1, %v904_v63 }
 0x1e2   : > { %953 = sbr.rel (!%p1412_p6) target bundleno = 489 (0x1e9), region = 78 }
 0x1e3   : > { %v929_v0 = vpop.xlane.xlu0 %928  ;;  %v907_v1 = vpop.xlane.xlu1 %906 }
 0x1e4   : > { %935 = vst.msk [vmem:[%s412_s12 + $0x10] sm:$0xff] %vm908_vm1, %v929_v0  ;;  %912 = vst.msk [vmem:[%s407_s9 + $0x18] sm:$0xff] %vm908_vm1, %v907_v1 }
 0x1e7   : > { %v932_v2 = vpop.xlane.xlu1 %931 }
 0x1e8   : > { %936 = vst.msk [vmem:[%s412_s12 + $0x18] sm:$0xff] %vm908_vm1, %v932_v2 }
 0x1e9 PF: > { %s15_s19 = sadd.s32 1, %s1349_s19   ;;  %s1619_s15 = smov %s1337_s16 }
 0x1ea   : > { %p12_p12 = scmp.ge.s32.totalorder %s15_s19, 4   ;;  %s1620_s16 = smov %s1417_s25 }
 0x1eb   : > { %s1621_s17 = smov %s1345_s18  ;;  %s1622_s18 = smov %s1624_s20 }
 0x1ec   :  { %14 = sbr.rel (!%p12_p12) target bundleno = 3 (0x3), region = 171 }

</bundles_post_ra>
